<compile_context>
chip_gen: v5e
topology: v5e:2x2
jax: 0.10.0
libtpu: 0.0.40
codegen_flags: <defaults>
</compile_context>

<pallas_src>
import functools

import jax
import jax.numpy as jnp
from jax.experimental import pallas as pl
from jax.experimental.pallas import tpu as pltpu

EPS = 1e-5


def _upsample_merge_kernel(x_ref, w_ref, b_ref, l_ref, o_ref, *, H, W, TH, Cout):
    """Fused: 1x1 conv (BN scale folded) + shift + ReLU -> bilinear x2 -> + skip.

    x_ref : (1, H*W, Cin)            bf16  whole bottom image (resident across h)
    w_ref : (Cin, Cout)              bf16  1x1 weight with BN scale folded in
    b_ref : (1, Cout)                f32   folded BN shift
    l_ref : (1, TH, 2, W, 2*Cout)    bf16  skip tile, (row-parity, col-parity) packed
    o_ref : (1, TH, 2, W, 2*Cout)    bf16  output tile, same packing
    """
    f32 = jnp.float32
    h = pl.program_id(1)

    # ---- 1x1 conv + folded BN + ReLU (MXU bf16, f32 accumulate/epilogue) ----
    base = pl.multiple_of(h * (TH * W), TH * W)
    xt = x_ref[0, pl.ds(base, TH * W), :]                            # (TH*W, Cin)
    acc = jnp.dot(xt, w_ref[...], preferred_element_type=f32)
    feat = jnp.maximum(acc + b_ref[...], 0.0).reshape(TH, W, Cout)   # (TH, W, C)

    # Halo rows above/below the tile (clamped at the image border): re-run the
    # tiny 1x1 conv on one row each -- cheaper than a halo DMA, exact semantics.
    prev_start = pl.multiple_of(jnp.maximum(h * TH - 1, 0) * W, W)
    next_start = pl.multiple_of(jnp.minimum(h * TH + TH, H - 1) * W, W)
    xp = x_ref[0, pl.ds(prev_start, W), :]                           # (W, Cin)
    xn = x_ref[0, pl.ds(next_start, W), :]
    featp = jnp.maximum(
        jnp.dot(xp, w_ref[...], preferred_element_type=f32) + b_ref[...], 0.0)
    featn = jnp.maximum(
        jnp.dot(xn, w_ref[...], preferred_element_type=f32) + b_ref[...], 0.0)

    # ---- bilinear x2 along W: XLU rolls + 1-column border fix-up (no scratch) ----
    def w_taps(t, axis):
        cols = jax.lax.broadcasted_iota(jnp.int32, t.shape, axis)
        prv = jnp.where(cols == 0, t, pltpu.roll(t, shift=1, axis=axis))      # t[j-1]
        nxt = jnp.where(cols == W - 1, t, pltpu.roll(t, shift=W - 1, axis=axis))  # t[j+1]
        return 0.25 * prv + 0.75 * t, 0.75 * t + 0.25 * nxt   # output cols 2j, 2j+1

    col_e, col_o = w_taps(feat, axis=1)        # (TH, W, C) each
    pe, po = w_taps(featp, axis=0)             # (W, C): halo row above the tile
    ne, no = w_taps(featn, axis=0)             # (W, C): halo row below the tile

    # ---- bilinear x2 along H + skip add, parity-packed lane-dense stores ----
    odt = o_ref.dtype
    for cp, col, hp, hn in ((0, col_e, pe, ne), (1, col_o, po, no)):
        lo = cp * Cout
        hi = lo + Cout
        # output row 2i (row-parity 0): 0.25*col[i-1] + 0.75*col[i]
        o_ref[0, 1:, 0, :, lo:hi] = (
            0.25 * col[:-1] + 0.75 * col[1:]
            + l_ref[0, 1:, 0, :, lo:hi].astype(f32)).astype(odt)
        o_ref[0, 0, 0, :, lo:hi] = (
            0.25 * hp + 0.75 * col[0]
            + l_ref[0, 0, 0, :, lo:hi].astype(f32)).astype(odt)
        # output row 2i+1 (row-parity 1): 0.75*col[i] + 0.25*col[i+1]
        o_ref[0, :-1, 1, :, lo:hi] = (
            0.75 * col[:-1] + 0.25 * col[1:]
            + l_ref[0, :-1, 1, :, lo:hi].astype(f32)).astype(odt)
        o_ref[0, TH - 1, 1, :, lo:hi] = (
            0.75 * col[TH - 1] + 0.25 * hn
            + l_ref[0, TH - 1, 1, :, lo:hi].astype(f32)).astype(odt)


def upsample_merge_nhwc(bottom, left, w, bn_scale, bn_shift, *, row_tile=None):
    """UpsampleMerge, NHWC fast path.

    bottom (N,H,W,Cin) f32/bf16, left (N,2H,2W,Cout) -> (N,2H,2W,Cout) bf16.
    """
    N, H, W, Cin = bottom.shape
    Cout = w.shape[1]
    assert left.shape == (N, 2 * H, 2 * W, Cout), left.shape
    TH = row_tile if row_tile is not None else min(H, 8)
    assert H % TH == 0, (H, TH)

    x = bottom.astype(jnp.bfloat16).reshape(N, H * W, Cin)
    # Fold BN scale into the 1x1 weight in f32, THEN cast to bf16 for the MXU.
    wf = (w.astype(jnp.float32) * bn_scale.astype(jnp.float32)[None, :]
          ).astype(jnp.bfloat16)
    b = bn_shift.reshape(1, Cout).astype(jnp.float32)
    # (N,2H,2W,C) -> (N,H,2,W,2C): contiguous (free) parity-packing reshape.
    lp = left.astype(jnp.bfloat16).reshape(N, H, 2, W, 2 * Cout)

    kernel = functools.partial(_upsample_merge_kernel, H=H, W=W, TH=TH, Cout=Cout)
    out = pl.pallas_call(
        kernel,
        out_shape=jax.ShapeDtypeStruct((N, H, 2, W, 2 * Cout), jnp.bfloat16),
        grid=(N, H // TH),
        in_specs=[
            pl.BlockSpec((1, H * W, Cin), lambda n, h: (n, 0, 0)),   # resident per image
            pl.BlockSpec((Cin, Cout), lambda n, h: (0, 0)),
            pl.BlockSpec((1, Cout), lambda n, h: (0, 0)),
            pl.BlockSpec((1, TH, 2, W, 2 * Cout), lambda n, h: (n, h, 0, 0, 0)),
        ],
        out_specs=pl.BlockSpec((1, TH, 2, W, 2 * Cout), lambda n, h: (n, h, 0, 0, 0)),
        compiler_params=pltpu.CompilerParams(
            dimension_semantics=("parallel", "parallel")),
    )(x, wf, b, lp)

    return out.reshape(N, 2 * H, 2 * W, Cout)


def upsample_merge_nchw(bottom_nchw, left_nchw, w, bn_scale, bn_shift):
    """Drop-in PyTorch-layout adapter (slow path: adds transposes; prefer NHWC)."""
    out = upsample_merge_nhwc(jnp.transpose(bottom_nchw, (0, 2, 3, 1)),
                              jnp.transpose(left_nchw, (0, 2, 3, 1)),
                              w, bn_scale, bn_shift)
    return jnp.transpose(out, (0, 3, 1, 2))


# ----------------------------- parameters & reference -----------------------------

def fold_bn(gamma, beta, mean, var, eps=EPS):
    scale = gamma / jnp.sqrt(var + eps)
    return scale.astype(jnp.float32), (beta - mean * scale).astype(jnp.float32)


def _interp_matrix(out_size, in_size):
    # PyTorch bilinear, align_corners=False.
    o = jnp.arange(out_size, dtype=jnp.float32)
    src = jnp.maximum((o + 0.5) * (in_size / out_size) - 0.5, 0.0)
    i0 = jnp.clip(jnp.floor(src).astype(jnp.int32), 0, in_size - 1)
    i1 = jnp.minimum(i0 + 1, in_size - 1)
    w1 = src - i0.astype(jnp.float32)
    w0 = 1.0 - w1
    return (w0[:, None] * jax.nn.one_hot(i0, in_size, dtype=jnp.float32)
            + w1[:, None] * jax.nn.one_hot(i1, in_size, dtype=jnp.float32))


def reference_nhwc(bottom, left, w, bn_scale, bn_shift):
    """Pure-JAX f32 reference (same bf16-cast matmul operands, f32 everywhere else)."""
    hp = jax.lax.Precision.HIGHEST
    xb = bottom.astype(jnp.bfloat16).astype(jnp.float32)
    wf = (w.astype(jnp.float32) * bn_scale[None, :]).astype(jnp.bfloat16)
    y = jnp.einsum('nhwk,kc->nhwc', xb, wf.astype(jnp.float32), precision=hp)
    y = jnp.maximum(y + bn_shift, 0.0)
    _, H, W, _ = y.shape
    Ah = _interp_matrix(2 * H, H)
    Aw = _interp_matrix(2 * W, W)
    y = jnp.einsum('oh,nhwc->nowc', Ah, y, precision=hp)
    y = jnp.einsum('pw,nowc->nopc', Aw, y, precision=hp)
    return y + left.astype(jnp.float32)


if __name__ == "__main__":
    key = jax.random.PRNGKey(0)
    kb, kl, kw, kg, kbe, km, kv = jax.random.split(key, 7)

    N, Cin, Cout, H, W = 2, 256, 128, 16, 16            # UpsampleMerge(256 -> 128)
    bottom = jax.random.normal(kb, (N, H, W, Cin), jnp.float32)          # NHWC
    left = jax.random.normal(kl, (N, 2 * H, 2 * W, Cout), jnp.float32)   # NHWC

    w = jax.random.normal(kw, (Cin, Cout), jnp.float32) * (2.0 / Cin) ** 0.5
    gamma = 1.0 + 0.1 * jax.random.normal(kg, (Cout,), jnp.float32)
    beta = 0.1 * jax.random.normal(kbe, (Cout,), jnp.float32)
    mean = 0.1 * jax.random.normal(km, (Cout,), jnp.float32)
    var = 1.0 + 0.5 * jax.random.uniform(kv, (Cout,), jnp.float32)
    scale, shift = fold_bn(gamma, beta, mean, var)

    fwd = jax.jit(upsample_merge_nhwc)
    out = jax.block_until_ready(fwd(bottom, left, w, scale, shift))

    assert out.shape == (N, 2 * H, 2 * W, Cout), out.shape
    out_f32 = out.astype(jnp.float32)
    assert bool(jnp.all(jnp.isfinite(out_f32)))

    ref = reference_nhwc(bottom, left, w, scale, shift)
    max_err = float(jnp.max(jnp.abs(out_f32 - ref)))
    # Output and skip are carried in bf16 (perf review): error budget is ~1 bf16
    # ulp of the largest activation (~8), i.e. ~0.03; everything else is f32.
    assert max_err < 5e-2, max_err
    print("KERNEL_OK")
</pallas_src>

<mosaic_0001>
module attributes {stable_mosaic.version = 11 : i64} {
  func.func @_upsample_merge_kernel(%arg0: i32, %arg1: i32, %arg2: memref<1x256x256xbf16, #tpu.memory_space<vmem>>, %arg3: memref<256x128xbf16, #tpu.memory_space<vmem>>, %arg4: memref<1x128xf32, #tpu.memory_space<vmem>>, %arg5: memref<1x8x2x16x256xbf16, #tpu.memory_space<vmem>>, %arg6: memref<1x8x2x16x256xbf16, #tpu.memory_space<vmem>>) attributes {dimension_semantics = [#tpu.dimension_semantics<parallel>, #tpu.dimension_semantics<parallel>], iteration_bounds = array<i64: 2, 2>, scalar_prefetch = 0 : i64, scratch_operands = 0 : i64, tpu.core_type = #tpu.core_type<tc>, window_params = [{transform_indices = @transform_0, window_bounds = array<i64: 1, 256, 256>}, {pipeline_mode = #tpu.pipeline_mode<synchronous>, transform_indices = @transform_1, window_bounds = array<i64: 256, 128>}, {pipeline_mode = #tpu.pipeline_mode<synchronous>, transform_indices = @transform_2, window_bounds = array<i64: 1, 128>}, {transform_indices = @transform_3, window_bounds = array<i64: 1, 8, 2, 16, 256>}, {transform_indices = @transform_4, window_bounds = array<i64: 1, 8, 2, 16, 256>}]} {
    %c128_i32 = arith.constant 128 : i32
    %0 = arith.muli %arg1, %c128_i32 : i32
    %1 = tpu.assume_multiple %0, 128 : i32
    %c0 = arith.constant 0 : index
    %2 = arith.index_cast %1 : i32 to index
    %c0_0 = arith.constant 0 : index
    %3 = vector.load %arg2[%c0, %2, %c0_0] : memref<1x256x256xbf16, #tpu.memory_space<vmem>>, vector<1x128x256xbf16>
    %4 = vector.shape_cast %3 : vector<1x128x256xbf16> to vector<128x256xbf16>
    %c0_1 = arith.constant 0 : index
    %c0_2 = arith.constant 0 : index
    %5 = vector.load %arg3[%c0_1, %c0_2] : memref<256x128xbf16, #tpu.memory_space<vmem>>, vector<256x128xbf16>
    %cst = arith.constant dense<0.000000e+00> : vector<128x128xf32>
    %6 = tpu.matmul %4, %5, %cst {dimension_numbers = #tpu.dot_dimension_numbers<[1], [0], [0], [1], [0, 0, 1, 1], [], []>} : vector<128x256xbf16>, vector<256x128xbf16>, vector<128x128xf32> -> vector<128x128xf32>
    %c0_3 = arith.constant 0 : index
    %c0_4 = arith.constant 0 : index
    %7 = vector.load %arg4[%c0_3, %c0_4] : memref<1x128xf32, #tpu.memory_space<vmem>>, vector<1x128xf32>
    %8 = vector.broadcast %7 : vector<1x128xf32> to vector<128x128xf32>
    %9 = arith.addf %6, %8 : vector<128x128xf32>
    %cst_5 = arith.constant 0.000000e+00 : f32
    %10 = vector.broadcast %cst_5 : f32 to vector<128x128xf32>
    %11 = arith.maximumf %9, %10 : vector<128x128xf32>
    %12 = vector.shape_cast %11 : vector<128x128xf32> to vector<8x16x128xf32>
    %c8_i32 = arith.constant 8 : i32
    %13 = arith.muli %arg1, %c8_i32 : i32
    %c1_i32 = arith.constant 1 : i32
    %14 = arith.subi %13, %c1_i32 : i32
    %c0_i32 = arith.constant 0 : i32
    %15 = arith.maxsi %14, %c0_i32 : i32
    %c16_i32 = arith.constant 16 : i32
    %16 = arith.muli %15, %c16_i32 : i32
    %17 = tpu.assume_multiple %16, 16 : i32
    %c8_i32_6 = arith.constant 8 : i32
    %18 = arith.muli %arg1, %c8_i32_6 : i32
    %c8_i32_7 = arith.constant 8 : i32
    %19 = arith.addi %18, %c8_i32_7 : i32
    %c15_i32 = arith.constant 15 : i32
    %20 = arith.minsi %19, %c15_i32 : i32
    %c16_i32_8 = arith.constant 16 : i32
    %21 = arith.muli %20, %c16_i32_8 : i32
    %22 = tpu.assume_multiple %21, 16 : i32
    %c0_9 = arith.constant 0 : index
    %23 = arith.index_cast %17 : i32 to index
    %c0_10 = arith.constant 0 : index
    %24 = vector.load %arg2[%c0_9, %23, %c0_10] : memref<1x256x256xbf16, #tpu.memory_space<vmem>>, vector<1x16x256xbf16>
    %25 = vector.shape_cast %24 : vector<1x16x256xbf16> to vector<16x256xbf16>
    %c0_11 = arith.constant 0 : index
    %26 = arith.index_cast %22 : i32 to index
    %c0_12 = arith.constant 0 : index
    %27 = vector.load %arg2[%c0_11, %26, %c0_12] : memref<1x256x256xbf16, #tpu.memory_space<vmem>>, vector<1x16x256xbf16>
    %28 = vector.shape_cast %27 : vector<1x16x256xbf16> to vector<16x256xbf16>
    %c0_13 = arith.constant 0 : index
    %c0_14 = arith.constant 0 : index
    %29 = vector.load %arg3[%c0_13, %c0_14] : memref<256x128xbf16, #tpu.memory_space<vmem>>, vector<256x128xbf16>
    %cst_15 = arith.constant dense<0.000000e+00> : vector<16x128xf32>
    %30 = tpu.matmul %25, %29, %cst_15 {dimension_numbers = #tpu.dot_dimension_numbers<[1], [0], [0], [1], [0, 0, 1, 1], [], []>} : vector<16x256xbf16>, vector<256x128xbf16>, vector<16x128xf32> -> vector<16x128xf32>
    %c0_16 = arith.constant 0 : index
    %c0_17 = arith.constant 0 : index
    %31 = vector.load %arg4[%c0_16, %c0_17] : memref<1x128xf32, #tpu.memory_space<vmem>>, vector<1x128xf32>
    %32 = vector.broadcast %31 : vector<1x128xf32> to vector<16x128xf32>
    %33 = arith.addf %30, %32 : vector<16x128xf32>
    %cst_18 = arith.constant 0.000000e+00 : f32
    %34 = vector.broadcast %cst_18 : f32 to vector<16x128xf32>
    %35 = arith.maximumf %33, %34 : vector<16x128xf32>
    %c0_19 = arith.constant 0 : index
    %c0_20 = arith.constant 0 : index
    %36 = vector.load %arg3[%c0_19, %c0_20] : memref<256x128xbf16, #tpu.memory_space<vmem>>, vector<256x128xbf16>
    %cst_21 = arith.constant dense<0.000000e+00> : vector<16x128xf32>
    %37 = tpu.matmul %28, %36, %cst_21 {dimension_numbers = #tpu.dot_dimension_numbers<[1], [0], [0], [1], [0, 0, 1, 1], [], []>} : vector<16x256xbf16>, vector<256x128xbf16>, vector<16x128xf32> -> vector<16x128xf32>
    %c0_22 = arith.constant 0 : index
    %c0_23 = arith.constant 0 : index
    %38 = vector.load %arg4[%c0_22, %c0_23] : memref<1x128xf32, #tpu.memory_space<vmem>>, vector<1x128xf32>
    %39 = vector.broadcast %38 : vector<1x128xf32> to vector<16x128xf32>
    %40 = arith.addf %37, %39 : vector<16x128xf32>
    %cst_24 = arith.constant 0.000000e+00 : f32
    %41 = vector.broadcast %cst_24 : f32 to vector<16x128xf32>
    %42 = arith.maximumf %40, %41 : vector<16x128xf32>
    %43 = tpu.iota {dimensions = array<i32: 1>} : vector<8x16x128xi32>
    %c0_i32_25 = arith.constant 0 : i32
    %44 = vector.broadcast %c0_i32_25 : i32 to vector<8x16x128xi32>
    %45 = arith.cmpi eq, %43, %44 : vector<8x16x128xi32>
    %c1_i32_26 = arith.constant 1 : i32
    %46 = tpu.dynamic_rotate %12 by %c1_i32_26 dim 1 : vector<8x16x128xf32>, i32 -> vector<8x16x128xf32>
    %47 = arith.select %45, %12, %46 : vector<8x16x128xi1>, vector<8x16x128xf32>
    %c15_i32_27 = arith.constant 15 : i32
    %48 = vector.broadcast %c15_i32_27 : i32 to vector<8x16x128xi32>
    %49 = arith.cmpi eq, %43, %48 : vector<8x16x128xi32>
    %c15_i32_28 = arith.constant 15 : i32
    %50 = tpu.dynamic_rotate %12 by %c15_i32_28 dim 1 : vector<8x16x128xf32>, i32 -> vector<8x16x128xf32>
    %51 = arith.select %49, %12, %50 : vector<8x16x128xi1>, vector<8x16x128xf32>
    %cst_29 = arith.constant 2.500000e-01 : f32
    %52 = vector.broadcast %cst_29 : f32 to vector<8x16x128xf32>
    %53 = arith.mulf %52, %47 : vector<8x16x128xf32>
    %cst_30 = arith.constant 7.500000e-01 : f32
    %54 = vector.broadcast %cst_30 : f32 to vector<8x16x128xf32>
    %55 = arith.mulf %54, %12 : vector<8x16x128xf32>
    %56 = arith.addf %53, %55 : vector<8x16x128xf32>
    %cst_31 = arith.constant 7.500000e-01 : f32
    %57 = vector.broadcast %cst_31 : f32 to vector<8x16x128xf32>
    %58 = arith.mulf %57, %12 : vector<8x16x128xf32>
    %cst_32 = arith.constant 2.500000e-01 : f32
    %59 = vector.broadcast %cst_32 : f32 to vector<8x16x128xf32>
    %60 = arith.mulf %59, %51 : vector<8x16x128xf32>
    %61 = arith.addf %58, %60 : vector<8x16x128xf32>
    %62 = tpu.iota {dimensions = array<i32: 0>} : vector<16x128xi32>
    %c0_i32_33 = arith.constant 0 : i32
    %63 = vector.broadcast %c0_i32_33 : i32 to vector<16x128xi32>
    %64 = arith.cmpi eq, %62, %63 : vector<16x128xi32>
    %c1_i32_34 = arith.constant 1 : i32
    %65 = tpu.dynamic_rotate %35 by %c1_i32_34 dim 0 : vector<16x128xf32>, i32 -> vector<16x128xf32>
    %66 = arith.select %64, %35, %65 : vector<16x128xi1>, vector<16x128xf32>
    %c15_i32_35 = arith.constant 15 : i32
    %67 = vector.broadcast %c15_i32_35 : i32 to vector<16x128xi32>
    %68 = arith.cmpi eq, %62, %67 : vector<16x128xi32>
    %c15_i32_36 = arith.constant 15 : i32
    %69 = tpu.dynamic_rotate %35 by %c15_i32_36 dim 0 : vector<16x128xf32>, i32 -> vector<16x128xf32>
    %70 = arith.select %68, %35, %69 : vector<16x128xi1>, vector<16x128xf32>
    %cst_37 = arith.constant 2.500000e-01 : f32
    %71 = vector.broadcast %cst_37 : f32 to vector<16x128xf32>
    %72 = arith.mulf %71, %66 : vector<16x128xf32>
    %cst_38 = arith.constant 7.500000e-01 : f32
    %73 = vector.broadcast %cst_38 : f32 to vector<16x128xf32>
    %74 = arith.mulf %73, %35 : vector<16x128xf32>
    %75 = arith.addf %72, %74 : vector<16x128xf32>
    %cst_39 = arith.constant 7.500000e-01 : f32
    %76 = vector.broadcast %cst_39 : f32 to vector<16x128xf32>
    %77 = arith.mulf %76, %35 : vector<16x128xf32>
    %cst_40 = arith.constant 2.500000e-01 : f32
    %78 = vector.broadcast %cst_40 : f32 to vector<16x128xf32>
    %79 = arith.mulf %78, %70 : vector<16x128xf32>
    %80 = arith.addf %77, %79 : vector<16x128xf32>
    %81 = tpu.iota {dimensions = array<i32: 0>} : vector<16x128xi32>
    %c0_i32_41 = arith.constant 0 : i32
    %82 = vector.broadcast %c0_i32_41 : i32 to vector<16x128xi32>
    %83 = arith.cmpi eq, %81, %82 : vector<16x128xi32>
    %c1_i32_42 = arith.constant 1 : i32
    %84 = tpu.dynamic_rotate %42 by %c1_i32_42 dim 0 : vector<16x128xf32>, i32 -> vector<16x128xf32>
    %85 = arith.select %83, %42, %84 : vector<16x128xi1>, vector<16x128xf32>
    %c15_i32_43 = arith.constant 15 : i32
    %86 = vector.broadcast %c15_i32_43 : i32 to vector<16x128xi32>
    %87 = arith.cmpi eq, %81, %86 : vector<16x128xi32>
    %c15_i32_44 = arith.constant 15 : i32
    %88 = tpu.dynamic_rotate %42 by %c15_i32_44 dim 0 : vector<16x128xf32>, i32 -> vector<16x128xf32>
    %89 = arith.select %87, %42, %88 : vector<16x128xi1>, vector<16x128xf32>
    %cst_45 = arith.constant 2.500000e-01 : f32
    %90 = vector.broadcast %cst_45 : f32 to vector<16x128xf32>
    %91 = arith.mulf %90, %85 : vector<16x128xf32>
    %cst_46 = arith.constant 7.500000e-01 : f32
    %92 = vector.broadcast %cst_46 : f32 to vector<16x128xf32>
    %93 = arith.mulf %92, %42 : vector<16x128xf32>
    %94 = arith.addf %91, %93 : vector<16x128xf32>
    %cst_47 = arith.constant 7.500000e-01 : f32
    %95 = vector.broadcast %cst_47 : f32 to vector<16x128xf32>
    %96 = arith.mulf %95, %42 : vector<16x128xf32>
    %cst_48 = arith.constant 2.500000e-01 : f32
    %97 = vector.broadcast %cst_48 : f32 to vector<16x128xf32>
    %98 = arith.mulf %97, %89 : vector<16x128xf32>
    %99 = arith.addf %96, %98 : vector<16x128xf32>
    %100 = vector.extract_strided_slice %56 {offsets = [0, 0, 0], sizes = [7, 16, 128], strides = [1, 1, 1]} : vector<8x16x128xf32> to vector<7x16x128xf32>
    %cst_49 = arith.constant 2.500000e-01 : f32
    %101 = vector.broadcast %cst_49 : f32 to vector<7x16x128xf32>
    %102 = arith.mulf %101, %100 : vector<7x16x128xf32>
    %103 = vector.extract_strided_slice %56 {offsets = [1, 0, 0], sizes = [7, 16, 128], strides = [1, 1, 1]} : vector<8x16x128xf32> to vector<7x16x128xf32>
    %cst_50 = arith.constant 7.500000e-01 : f32
    %104 = vector.broadcast %cst_50 : f32 to vector<7x16x128xf32>
    %105 = arith.mulf %104, %103 : vector<7x16x128xf32>
    %106 = arith.addf %102, %105 : vector<7x16x128xf32>
    %c0_51 = arith.constant 0 : index
    %c1 = arith.constant 1 : index
    %c0_52 = arith.constant 0 : index
    %c0_53 = arith.constant 0 : index
    %c0_54 = arith.constant 0 : index
    %107 = vector.load %arg5[%c0_51, %c1, %c0_52, %c0_53, %c0_54] : memref<1x8x2x16x256xbf16, #tpu.memory_space<vmem>>, vector<1x7x1x16x128xbf16>
    %108 = vector.shape_cast %107 : vector<1x7x1x16x128xbf16> to vector<7x16x128xbf16>
    %109 = arith.extf %108 : vector<7x16x128xbf16> to vector<7x16x128xf32>
    %110 = arith.addf %106, %109 : vector<7x16x128xf32>
    %111 = arith.truncf %110 : vector<7x16x128xf32> to vector<7x16x128xbf16>
    %c0_55 = arith.constant 0 : index
    %c1_56 = arith.constant 1 : index
    %c0_57 = arith.constant 0 : index
    %c0_58 = arith.constant 0 : index
    %c0_59 = arith.constant 0 : index
    %112 = vector.load %arg6[%c0_55, %c1_56, %c0_57, %c0_58, %c0_59] : memref<1x8x2x16x256xbf16, #tpu.memory_space<vmem>>, vector<1x7x1x16x128xbf16>
    %113 = vector.shape_cast %112 : vector<1x7x1x16x128xbf16> to vector<7x16x128xbf16>
    %114 = vector.shape_cast %111 : vector<7x16x128xbf16> to vector<1x7x1x16x128xbf16>
    tpu.vector_store %arg6[%c0_55, %c1_56, %c0_57, %c0_58, %c0_59], %114 {strides = array<i32>} : memref<1x8x2x16x256xbf16, #tpu.memory_space<vmem>>, vector<1x7x1x16x128xbf16>,
    %cst_60 = arith.constant 2.500000e-01 : f32
    %115 = vector.broadcast %cst_60 : f32 to vector<16x128xf32>
    %116 = arith.mulf %115, %75 : vector<16x128xf32>
    %117 = vector.extract_strided_slice %56 {offsets = [0, 0, 0], sizes = [1, 16, 128], strides = [1, 1, 1]} : vector<8x16x128xf32> to vector<1x16x128xf32>
    %118 = vector.shape_cast %117 : vector<1x16x128xf32> to vector<16x128xf32>
    %cst_61 = arith.constant 7.500000e-01 : f32
    %119 = vector.broadcast %cst_61 : f32 to vector<16x128xf32>
    %120 = arith.mulf %119, %118 : vector<16x128xf32>
    %121 = arith.addf %116, %120 : vector<16x128xf32>
    %c0_62 = arith.constant 0 : index
    %c0_63 = arith.constant 0 : index
    %c0_64 = arith.constant 0 : index
    %c0_65 = arith.constant 0 : index
    %c0_66 = arith.constant 0 : index
    %122 = vector.load %arg5[%c0_62, %c0_63, %c0_64, %c0_65, %c0_66] : memref<1x8x2x16x256xbf16, #tpu.memory_space<vmem>>, vector<1x1x1x16x128xbf16>
    %123 = vector.shape_cast %122 : vector<1x1x1x16x128xbf16> to vector<16x128xbf16>
    %124 = arith.extf %123 : vector<16x128xbf16> to vector<16x128xf32>
    %125 = arith.addf %121, %124 : vector<16x128xf32>
    %126 = arith.truncf %125 : vector<16x128xf32> to vector<16x128xbf16>
    %c0_67 = arith.constant 0 : index
    %c0_68 = arith.constant 0 : index
    %c0_69 = arith.constant 0 : index
    %c0_70 = arith.constant 0 : index
    %c0_71 = arith.constant 0 : index
    %127 = vector.load %arg6[%c0_67, %c0_68, %c0_69, %c0_70, %c0_71] : memref<1x8x2x16x256xbf16, #tpu.memory_space<vmem>>, vector<1x1x1x16x128xbf16>
    %128 = vector.shape_cast %127 : vector<1x1x1x16x128xbf16> to vector<16x128xbf16>
    %129 = vector.shape_cast %126 : vector<16x128xbf16> to vector<1x1x1x16x128xbf16>
    tpu.vector_store %arg6[%c0_67, %c0_68, %c0_69, %c0_70, %c0_71], %129 {strides = array<i32>} : memref<1x8x2x16x256xbf16, #tpu.memory_space<vmem>>, vector<1x1x1x16x128xbf16>,
    %130 = vector.extract_strided_slice %56 {offsets = [0, 0, 0], sizes = [7, 16, 128], strides = [1, 1, 1]} : vector<8x16x128xf32> to vector<7x16x128xf32>
    %cst_72 = arith.constant 7.500000e-01 : f32
    %131 = vector.broadcast %cst_72 : f32 to vector<7x16x128xf32>
    %132 = arith.mulf %131, %130 : vector<7x16x128xf32>
    %133 = vector.extract_strided_slice %56 {offsets = [1, 0, 0], sizes = [7, 16, 128], strides = [1, 1, 1]} : vector<8x16x128xf32> to vector<7x16x128xf32>
    %cst_73 = arith.constant 2.500000e-01 : f32
    %134 = vector.broadcast %cst_73 : f32 to vector<7x16x128xf32>
    %135 = arith.mulf %134, %133 : vector<7x16x128xf32>
    %136 = arith.addf %132, %135 : vector<7x16x128xf32>
    %c0_74 = arith.constant 0 : index
    %c0_75 = arith.constant 0 : index
    %c1_76 = arith.constant 1 : index
    %c0_77 = arith.constant 0 : index
    %c0_78 = arith.constant 0 : index
    %137 = vector.load %arg5[%c0_74, %c0_75, %c1_76, %c0_77, %c0_78] : memref<1x8x2x16x256xbf16, #tpu.memory_space<vmem>>, vector<1x7x1x16x128xbf16>
    %138 = vector.shape_cast %137 : vector<1x7x1x16x128xbf16> to vector<7x16x128xbf16>
    %139 = arith.extf %138 : vector<7x16x128xbf16> to vector<7x16x128xf32>
    %140 = arith.addf %136, %139 : vector<7x16x128xf32>
    %141 = arith.truncf %140 : vector<7x16x128xf32> to vector<7x16x128xbf16>
    %c0_79 = arith.constant 0 : index
    %c0_80 = arith.constant 0 : index
    %c1_81 = arith.constant 1 : index
    %c0_82 = arith.constant 0 : index
    %c0_83 = arith.constant 0 : index
    %142 = vector.load %arg6[%c0_79, %c0_80, %c1_81, %c0_82, %c0_83] : memref<1x8x2x16x256xbf16, #tpu.memory_space<vmem>>, vector<1x7x1x16x128xbf16>
    %143 = vector.shape_cast %142 : vector<1x7x1x16x128xbf16> to vector<7x16x128xbf16>
    %144 = vector.shape_cast %141 : vector<7x16x128xbf16> to vector<1x7x1x16x128xbf16>
    tpu.vector_store %arg6[%c0_79, %c0_80, %c1_81, %c0_82, %c0_83], %144 {strides = array<i32>} : memref<1x8x2x16x256xbf16, #tpu.memory_space<vmem>>, vector<1x7x1x16x128xbf16>,
    %145 = vector.extract_strided_slice %56 {offsets = [7, 0, 0], sizes = [1, 16, 128], strides = [1, 1, 1]} : vector<8x16x128xf32> to vector<1x16x128xf32>
    %146 = vector.shape_cast %145 : vector<1x16x128xf32> to vector<16x128xf32>
    %cst_84 = arith.constant 7.500000e-01 : f32
    %147 = vector.broadcast %cst_84 : f32 to vector<16x128xf32>
    %148 = arith.mulf %147, %146 : vector<16x128xf32>
    %cst_85 = arith.constant 2.500000e-01 : f32
    %149 = vector.broadcast %cst_85 : f32 to vector<16x128xf32>
    %150 = arith.mulf %149, %94 : vector<16x128xf32>
    %151 = arith.addf %148, %150 : vector<16x128xf32>
    %c0_86 = arith.constant 0 : index
    %c7 = arith.constant 7 : index
    %c1_87 = arith.constant 1 : index
    %c0_88 = arith.constant 0 : index
    %c0_89 = arith.constant 0 : index
    %152 = vector.load %arg5[%c0_86, %c7, %c1_87, %c0_88, %c0_89] : memref<1x8x2x16x256xbf16, #tpu.memory_space<vmem>>, vector<1x1x1x16x128xbf16>
    %153 = vector.shape_cast %152 : vector<1x1x1x16x128xbf16> to vector<16x128xbf16>
    %154 = arith.extf %153 : vector<16x128xbf16> to vector<16x128xf32>
    %155 = arith.addf %151, %154 : vector<16x128xf32>
    %156 = arith.truncf %155 : vector<16x128xf32> to vector<16x128xbf16>
    %c0_90 = arith.constant 0 : index
    %c7_91 = arith.constant 7 : index
    %c1_92 = arith.constant 1 : index
    %c0_93 = arith.constant 0 : index
    %c0_94 = arith.constant 0 : index
    %157 = vector.load %arg6[%c0_90, %c7_91, %c1_92, %c0_93, %c0_94] : memref<1x8x2x16x256xbf16, #tpu.memory_space<vmem>>, vector<1x1x1x16x128xbf16>
    %158 = vector.shape_cast %157 : vector<1x1x1x16x128xbf16> to vector<16x128xbf16>
    %159 = vector.shape_cast %156 : vector<16x128xbf16> to vector<1x1x1x16x128xbf16>
    tpu.vector_store %arg6[%c0_90, %c7_91, %c1_92, %c0_93, %c0_94], %159 {strides = array<i32>} : memref<1x8x2x16x256xbf16, #tpu.memory_space<vmem>>, vector<1x1x1x16x128xbf16>,
    %160 = vector.extract_strided_slice %61 {offsets = [0, 0, 0], sizes = [7, 16, 128], strides = [1, 1, 1]} : vector<8x16x128xf32> to vector<7x16x128xf32>
    %cst_95 = arith.constant 2.500000e-01 : f32
    %161 = vector.broadcast %cst_95 : f32 to vector<7x16x128xf32>
    %162 = arith.mulf %161, %160 : vector<7x16x128xf32>
    %163 = vector.extract_strided_slice %61 {offsets = [1, 0, 0], sizes = [7, 16, 128], strides = [1, 1, 1]} : vector<8x16x128xf32> to vector<7x16x128xf32>
    %cst_96 = arith.constant 7.500000e-01 : f32
    %164 = vector.broadcast %cst_96 : f32 to vector<7x16x128xf32>
    %165 = arith.mulf %164, %163 : vector<7x16x128xf32>
    %166 = arith.addf %162, %165 : vector<7x16x128xf32>
    %c0_97 = arith.constant 0 : index
    %c1_98 = arith.constant 1 : index
    %c0_99 = arith.constant 0 : index
    %c0_100 = arith.constant 0 : index
    %c128 = arith.constant 128 : index
    %167 = vector.load %arg5[%c0_97, %c1_98, %c0_99, %c0_100, %c128] : memref<1x8x2x16x256xbf16, #tpu.memory_space<vmem>>, vector<1x7x1x16x128xbf16>
    %168 = vector.shape_cast %167 : vector<1x7x1x16x128xbf16> to vector<7x16x128xbf16>
    %169 = arith.extf %168 : vector<7x16x128xbf16> to vector<7x16x128xf32>
    %170 = arith.addf %166, %169 : vector<7x16x128xf32>
    %171 = arith.truncf %170 : vector<7x16x128xf32> to vector<7x16x128xbf16>
    %c0_101 = arith.constant 0 : index
    %c1_102 = arith.constant 1 : index
    %c0_103 = arith.constant 0 : index
    %c0_104 = arith.constant 0 : index
    %c128_105 = arith.constant 128 : index
    %172 = vector.load %arg6[%c0_101, %c1_102, %c0_103, %c0_104, %c128_105] : memref<1x8x2x16x256xbf16, #tpu.memory_space<vmem>>, vector<1x7x1x16x128xbf16>
    %173 = vector.shape_cast %172 : vector<1x7x1x16x128xbf16> to vector<7x16x128xbf16>
    %174 = vector.shape_cast %171 : vector<7x16x128xbf16> to vector<1x7x1x16x128xbf16>
    tpu.vector_store %arg6[%c0_101, %c1_102, %c0_103, %c0_104, %c128_105], %174 {strides = array<i32>} : memref<1x8x2x16x256xbf16, #tpu.memory_space<vmem>>, vector<1x7x1x16x128xbf16>,
    %cst_106 = arith.constant 2.500000e-01 : f32
    %175 = vector.broadcast %cst_106 : f32 to vector<16x128xf32>
    %176 = arith.mulf %175, %80 : vector<16x128xf32>
    %177 = vector.extract_strided_slice %61 {offsets = [0, 0, 0], sizes = [1, 16, 128], strides = [1, 1, 1]} : vector<8x16x128xf32> to vector<1x16x128xf32>
    %178 = vector.shape_cast %177 : vector<1x16x128xf32> to vector<16x128xf32>
    %cst_107 = arith.constant 7.500000e-01 : f32
    %179 = vector.broadcast %cst_107 : f32 to vector<16x128xf32>
    %180 = arith.mulf %179, %178 : vector<16x128xf32>
    %181 = arith.addf %176, %180 : vector<16x128xf32>
    %c0_108 = arith.constant 0 : index
    %c0_109 = arith.constant 0 : index
    %c0_110 = arith.constant 0 : index
    %c0_111 = arith.constant 0 : index
    %c128_112 = arith.constant 128 : index
    %182 = vector.load %arg5[%c0_108, %c0_109, %c0_110, %c0_111, %c128_112] : memref<1x8x2x16x256xbf16, #tpu.memory_space<vmem>>, vector<1x1x1x16x128xbf16>
    %183 = vector.shape_cast %182 : vector<1x1x1x16x128xbf16> to vector<16x128xbf16>
    %184 = arith.extf %183 : vector<16x128xbf16> to vector<16x128xf32>
    %185 = arith.addf %181, %184 : vector<16x128xf32>
    %186 = arith.truncf %185 : vector<16x128xf32> to vector<16x128xbf16>
    %c0_113 = arith.constant 0 : index
    %c0_114 = arith.constant 0 : index
    %c0_115 = arith.constant 0 : index
    %c0_116 = arith.constant 0 : index
    %c128_117 = arith.constant 128 : index
    %187 = vector.load %arg6[%c0_113, %c0_114, %c0_115, %c0_116, %c128_117] : memref<1x8x2x16x256xbf16, #tpu.memory_space<vmem>>, vector<1x1x1x16x128xbf16>
    %188 = vector.shape_cast %187 : vector<1x1x1x16x128xbf16> to vector<16x128xbf16>
    %189 = vector.shape_cast %186 : vector<16x128xbf16> to vector<1x1x1x16x128xbf16>
    tpu.vector_store %arg6[%c0_113, %c0_114, %c0_115, %c0_116, %c128_117], %189 {strides = array<i32>} : memref<1x8x2x16x256xbf16, #tpu.memory_space<vmem>>, vector<1x1x1x16x128xbf16>,
    %190 = vector.extract_strided_slice %61 {offsets = [0, 0, 0], sizes = [7, 16, 128], strides = [1, 1, 1]} : vector<8x16x128xf32> to vector<7x16x128xf32>
    %cst_118 = arith.constant 7.500000e-01 : f32
    %191 = vector.broadcast %cst_118 : f32 to vector<7x16x128xf32>
    %192 = arith.mulf %191, %190 : vector<7x16x128xf32>
    %193 = vector.extract_strided_slice %61 {offsets = [1, 0, 0], sizes = [7, 16, 128], strides = [1, 1, 1]} : vector<8x16x128xf32> to vector<7x16x128xf32>
    %cst_119 = arith.constant 2.500000e-01 : f32
    %194 = vector.broadcast %cst_119 : f32 to vector<7x16x128xf32>
    %195 = arith.mulf %194, %193 : vector<7x16x128xf32>
    %196 = arith.addf %192, %195 : vector<7x16x128xf32>
    %c0_120 = arith.constant 0 : index
    %c0_121 = arith.constant 0 : index
    %c1_122 = arith.constant 1 : index
    %c0_123 = arith.constant 0 : index
    %c128_124 = arith.constant 128 : index
    %197 = vector.load %arg5[%c0_120, %c0_121, %c1_122, %c0_123, %c128_124] : memref<1x8x2x16x256xbf16, #tpu.memory_space<vmem>>, vector<1x7x1x16x128xbf16>
    %198 = vector.shape_cast %197 : vector<1x7x1x16x128xbf16> to vector<7x16x128xbf16>
    %199 = arith.extf %198 : vector<7x16x128xbf16> to vector<7x16x128xf32>
    %200 = arith.addf %196, %199 : vector<7x16x128xf32>
    %201 = arith.truncf %200 : vector<7x16x128xf32> to vector<7x16x128xbf16>
    %c0_125 = arith.constant 0 : index
    %c0_126 = arith.constant 0 : index
    %c1_127 = arith.constant 1 : index
    %c0_128 = arith.constant 0 : index
    %c128_129 = arith.constant 128 : index
    %202 = vector.load %arg6[%c0_125, %c0_126, %c1_127, %c0_128, %c128_129] : memref<1x8x2x16x256xbf16, #tpu.memory_space<vmem>>, vector<1x7x1x16x128xbf16>
    %203 = vector.shape_cast %202 : vector<1x7x1x16x128xbf16> to vector<7x16x128xbf16>
    %204 = vector.shape_cast %201 : vector<7x16x128xbf16> to vector<1x7x1x16x128xbf16>
    tpu.vector_store %arg6[%c0_125, %c0_126, %c1_127, %c0_128, %c128_129], %204 {strides = array<i32>} : memref<1x8x2x16x256xbf16, #tpu.memory_space<vmem>>, vector<1x7x1x16x128xbf16>,
    %205 = vector.extract_strided_slice %61 {offsets = [7, 0, 0], sizes = [1, 16, 128], strides = [1, 1, 1]} : vector<8x16x128xf32> to vector<1x16x128xf32>
    %206 = vector.shape_cast %205 : vector<1x16x128xf32> to vector<16x128xf32>
    %cst_130 = arith.constant 7.500000e-01 : f32
    %207 = vector.broadcast %cst_130 : f32 to vector<16x128xf32>
    %208 = arith.mulf %207, %206 : vector<16x128xf32>
    %cst_131 = arith.constant 2.500000e-01 : f32
    %209 = vector.broadcast %cst_131 : f32 to vector<16x128xf32>
    %210 = arith.mulf %209, %99 : vector<16x128xf32>
    %211 = arith.addf %208, %210 : vector<16x128xf32>
    %c0_132 = arith.constant 0 : index
    %c7_133 = arith.constant 7 : index
    %c1_134 = arith.constant 1 : index
    %c0_135 = arith.constant 0 : index
    %c128_136 = arith.constant 128 : index
    %212 = vector.load %arg5[%c0_132, %c7_133, %c1_134, %c0_135, %c128_136] : memref<1x8x2x16x256xbf16, #tpu.memory_space<vmem>>, vector<1x1x1x16x128xbf16>
    %213 = vector.shape_cast %212 : vector<1x1x1x16x128xbf16> to vector<16x128xbf16>
    %214 = arith.extf %213 : vector<16x128xbf16> to vector<16x128xf32>
    %215 = arith.addf %211, %214 : vector<16x128xf32>
    %216 = arith.truncf %215 : vector<16x128xf32> to vector<16x128xbf16>
    %c0_137 = arith.constant 0 : index
    %c7_138 = arith.constant 7 : index
    %c1_139 = arith.constant 1 : index
    %c0_140 = arith.constant 0 : index
    %c128_141 = arith.constant 128 : index
    %217 = vector.load %arg6[%c0_137, %c7_138, %c1_139, %c0_140, %c128_141] : memref<1x8x2x16x256xbf16, #tpu.memory_space<vmem>>, vector<1x1x1x16x128xbf16>
    %218 = vector.shape_cast %217 : vector<1x1x1x16x128xbf16> to vector<16x128xbf16>
    %219 = vector.shape_cast %216 : vector<16x128xbf16> to vector<1x1x1x16x128xbf16>
    tpu.vector_store %arg6[%c0_137, %c7_138, %c1_139, %c0_140, %c128_141], %219 {strides = array<i32>} : memref<1x8x2x16x256xbf16, #tpu.memory_space<vmem>>, vector<1x1x1x16x128xbf16>,
    return
  }
  func.func @transform_0(%arg0: i32, %arg1: i32) -> (i32, i32, i32) {
    %c0_i32 = arith.constant 0 : i32
    %c0_i32_0 = arith.constant 0 : i32
    %c0_i32_1 = arith.constant 0 : i32
    return %arg0, %c0_i32, %c0_i32_0 : i32, i32, i32
  }
  func.func @transform_1(%arg0: i32, %arg1: i32) -> (i32, i32) {
    %c0_i32 = arith.constant 0 : i32
    %c0_i32_0 = arith.constant 0 : i32
    %c0_i32_1 = arith.constant 0 : i32
    return %c0_i32, %c0_i32_0 : i32, i32
  }
  func.func @transform_2(%arg0: i32, %arg1: i32) -> (i32, i32) {
    %c0_i32 = arith.constant 0 : i32
    %c0_i32_0 = arith.constant 0 : i32
    %c0_i32_1 = arith.constant 0 : i32
    return %c0_i32, %c0_i32_0 : i32, i32
  }
  func.func @transform_3(%arg0: i32, %arg1: i32) -> (i32, i32, i32, i32, i32) {
    %c0_i32 = arith.constant 0 : i32
    %c0_i32_0 = arith.constant 0 : i32
    %c0_i32_1 = arith.constant 0 : i32
    %c0_i32_2 = arith.constant 0 : i32
    return %arg0, %arg1, %c0_i32, %c0_i32_0, %c0_i32_1 : i32, i32, i32, i32, i32
  }
  func.func @transform_4(%arg0: i32, %arg1: i32) -> (i32, i32, i32, i32, i32) {
    %c0_i32 = arith.constant 0 : i32
    %c0_i32_0 = arith.constant 0 : i32
    %c0_i32_1 = arith.constant 0 : i32
    %c0_i32_2 = arith.constant 0 : i32
    return %arg0, %arg1, %c0_i32, %c0_i32_0, %c0_i32_1 : i32, i32, i32, i32, i32
  }
}

</mosaic_0001>

<bundles_post_ra>
// kernel: upsample_merge_nhwc.1
= control target key start
LH: loop header
LB: loop body
LE: loop exit
PB: predicated region body
PF: predicated region fallthrough
CT: control target
= control target key end

     0   :  { %s1976_s15 = smov 0   ;;  %s1978_s16 = smov 0   ;;  %s2997_s0 = inlined_call_operand.vmem [shape: bf16[2,256,256], index: 0, kind: input, shape index: {}]   ;;  %s2998_s1 = inlined_call_operand.vmem [shape: bf16[256,128], index: 1, kind: input, shape index: {}]   ;;  %s2999_s2 = inlined_call_operand.vmem [shape: f32[1,128], index: 2, kind: input, shape index: {}]   ;;  %s3000_s3 = inlined_call_operand.vmem [shape: bf16[2,16,2,16,256], index: 3, kind: input, shape index: {}]   ;;  %s3001_s4 = inlined_call_operand.vmem [shape: bf16[2,16,2,16,256], index: 4, kind: output, shape index: {}]  }
   0x1   :  { %s1980_s17 = smov 0   ;;  %s1982_s18 = smov 0  }
   0x2   :  { %s1984_s19 = smov 0  }
   0x3 LB: > { %s23_s20 = sadd.s32 1, %s1941_s17  ;;  %s26_s21 = sadd.s32 1, %s1945_s18  ;;  %s1949_s19 = sphi %s1984_s19, %s14_s19   ;;  %s1945_s18 = sphi %s1982_s18, %s3040_s18   ;;  %s1941_s17 = sphi %s1980_s17, %s3039_s17   ;;  %s1937_s16 = sphi %s1978_s16, %s3038_s16   ;;  %s1933_s15 = sphi %s1976_s15, %s3037_s15  }
   0x4   : > { %p24_p0 = scmp.ge.s32.totalorder %s23_s20, 2  ;;  %p1525_p1 = scmp.ge.s32.totalorder %s1949_s19, 1 }
   0x5   : > { %p194_p2 = scmp.lt.s32.totalorder %s1949_s19, 5 }
   0x6   : > { %s3042_s20 = smov (%p24_p0, %s23_s20), 0  ;;  %s3044_s21 = smov (!%p24_p0, %s26_s21), %s1945_s18 }
   0x7   : > { %p195_p3 = pnand %p1525_p1, %p194_p2  ;;  %p28_p4 = scmp.ge.s32.totalorder %s3044_s21, 2 }
   0x9   : > { %s3046_s21 = smov (%p28_p4, %s3044_s21), 0  ;;  %198 = sbr.rel (%p195_p3) target bundleno = 345 (0x159), region = 36 }
   0xe   : > { %v2011_v0 = vld [vmem:[%s2998_s1 + $0x38] sm:$0xff]  ;;  %v2023_v2 = vld [vmem:[%s2998_s1 + $0x30] sm:$0xff]  ;;  %p235_p5 = scmp.lt.s32.totalorder %s1937_s16, 1  ;;  %s2033_s30 = sshll.u32 %s1933_s15, 3  ;;  %v2041_v4 = vld [vmem:[%s2998_s1 + $0x28] sm:$0xff] }
   0xf   : > { %v2016_v1 = vld [vmem:[%s2998_s1 + $0x78] sm:$0xff]  ;;  %496 = vmatpush.bf16.msra.mxu0 %v2011_v0  ;;  %1853 = vmatpush.bf16.msra.mxu2 %v2011_v0  ;;  %v2030_v3 = vld [vmem:[%s2998_s1 + $0x70] sm:$0xff]  ;;  %p243_p6 = scmp.lt.s32.totalorder %s2033_s30, 15  ;;  %v2048_v5 = vld [vmem:[%s2998_s1 + $0x68] sm:$0xff]  ;;  %s1668_s27 = sadd.s32 4294967295, %s2033_s30 }
  0x10   : > { %545 = vmatpush.bf16.msra.mxu1 %v2016_v1  ;;  %1861 = vmatpush.bf16.msra.mxu3 %v2016_v1  ;;  %s3048_s16 = smov (!%p235_p5, %s1937_s16), 1  ;;  %v2056_v6 = vld [vmem:[%s2998_s1 + $0x20] sm:$0xff]  ;;  %v2072_v8 = vld [vmem:[%s2998_s1 + $0x18] sm:$0xff]  ;;  %v2086_v10 = vld [vmem:[%s2998_s1 + $0x10] sm:$0xff]  ;;  %p612_p7 = scmp.gt.s32.totalorder %s1668_s27, 0 }
  0x11   : > { %s1530_s9 = sshll.u32 %s3048_s16, 7  ;;  %v2063_v7 = vld [vmem:[%s2998_s1 + $0x60] sm:$0xff]  ;;  %v2079_v9 = vld [vmem:[%s2998_s1 + $0x58] sm:$0xff]  ;;  %s1813_s28 = sshll.u32 %s3048_s16, 8  ;;  %v2093_v11 = vld [vmem:[%s2998_s1 + $0x50] sm:$0xff] }
  0x12   : > { %s244_s10 = scalar_select %p243_p6, %s2033_s30, 15  ;;  %v2106_v12 = vld [vmem:[%s2998_s1 + $0x8] sm:$0xff]  ;;  %v2121_v14 = vld [vmem:[%s2998_s1] sm:$0xff] }
  0x13   : > { %497 = vmatpush.bf16.msra.mxu0 %v2023_v2  ;;  %1854 = vmatpush.bf16.msra.mxu2 %v2023_v2  ;;  %v2116_v13 = vld [vmem:[%s2998_s1 + $0x48] sm:$0xff]  ;;  %v2134_v19 = vld [vmem:[%s2998_s1 + $0x40] sm:$0xff]  ;;  %s3050_s27 = smov (!%p612_p7, %s1668_s27), 0  ;;  %s615_s5 = sadd.s32 8, %s2033_s30 }
  0x14   : > { %546 = vmatpush.bf16.msra.mxu1 %v2030_v3  ;;  %1862 = vmatpush.bf16.msra.mxu3 %v2030_v3  ;;  %s1529_s22 = sshll.u32 %s244_s10, 3  ;;  %s1536_s10 = sshll.u32 %s1933_s15, 7 }
  0x15   : > { %s2065_s23 = sadd.s32 %s1530_s9, %s1529_s22  ;;  %s2098_s9 = scalar_lea.vmem %s2997_s0, %s1813_s28 }
  0x16   : > { %s2109_s13 = scalar_lea.vmem %s2098_s9, %s1536_s10  ;;  %s1669_s28 = sshll.u32 %s3050_s27, 4 }
  0x17   : > { %498 = vmatpush.bf16.msra.mxu0 %v2041_v4  ;;  %1855 = vmatpush.bf16.msra.mxu2 %v2041_v4  ;;  %v1541_v15 = vld [vmem:[%s2109_s13] sm:$0xf]  ;;  %v1816_v16 = vld [vmem:[%s2109_s13 + $0x4] sm:$0xf0]  ;;  %v1815_v20 = vld [vmem:[%s2109_s13 + $0x4] sm:$0xf]  ;;  %s623_s29 = scalar_lea.vmem %s2098_s9, %s1669_s28 }
  0x18   : > { %547 = vmatpush.bf16.msra.mxu1 %v2048_v5  ;;  %1863 = vmatpush.bf16.msra.mxu3 %v2048_v5  ;;  %v1589_v17 = vld [vmem:[%s2109_s13 + $0x60] sm:$0xf]  ;;  %v1828_v18 = vld [vmem:[%s2109_s13 + $0x64] sm:$0xf0]  ;;  %v1543_v21 = vld [vmem:[%s2109_s13 + $0x8] sm:$0xf0]  ;;  %v1542_v24 = vor.u32 %v1816_v16, %v1541_v15  ;;  %v713_v16 = vlaneseq }
  0x19   : > { %v1827_v22 = vld [vmem:[%s2109_s13 + $0x64] sm:$0xf]  ;;  %v1591_v23 = vld [vmem:[%s2109_s13 + $0x68] sm:$0xf0]  ;;  %v1590_v25 = vor.u32 %v1828_v18, %v1589_v17  ;;  %v1546_v26 = vor.u32 %v1815_v20, %v1543_v21  ;;  %v1549_v28 = vld [vmem:[%s2109_s13 + $0x10] sm:$0xf] }
  0x1a   : > { %v1594_v27 = vor.u32 %v1827_v22, %v1591_v23  ;;  %v1818_v29 = vld [vmem:[%s2109_s13 + $0x14] sm:$0xf0]  ;;  %v1597_v30 = vld [vmem:[%s2109_s13 + $0x70] sm:$0xf]  ;;  %v1817_v32 = vld [vmem:[%s2109_s13 + $0x14] sm:$0xf] }
  0x1b   : > { %499 = vmatpush.bf16.msra.mxu0 %v2056_v6  ;;  %1856 = vmatpush.bf16.msra.mxu2 %v2056_v6  ;;  %v1830_v31 = vld [vmem:[%s2109_s13 + $0x74] sm:$0xf0]  ;;  %v1551_v33 = vld [vmem:[%s2109_s13 + $0x18] sm:$0xf0]  ;;  %v1829_v34 = vld [vmem:[%s2109_s13 + $0x74] sm:$0xf]  ;;  %v1550_v36 = vor.u32 %v1818_v29, %v1549_v28 }
  0x1c   : > { %548 = vmatpush.bf16.msra.mxu1 %v2063_v7  ;;  %1864 = vmatpush.bf16.msra.mxu3 %v2063_v7  ;;  %v1599_v35 = vld [vmem:[%s2109_s13 + $0x78] sm:$0xf0]  ;;  %v1598_v37 = vor.u32 %v1830_v31, %v1597_v30  ;;  %v1554_v38 = vor.u32 %v1817_v32, %v1551_v33  ;;  %v1557_v40 = vld [vmem:[%s2109_s13 + $0x20] sm:$0xf]  ;;  %v1820_v41 = vld [vmem:[%s2109_s13 + $0x24] sm:$0xf0] }
  0x1d   : > { %v1602_v39 = vor.u32 %v1829_v34, %v1599_v35  ;;  %v1677_v42 = vld [vmem:[%s623_s29] sm:$0xf]  ;;  %v1849_v43 = vld [vmem:[%s623_s29 + $0x4] sm:$0xf0]  ;;  %v1819_v44 = vld [vmem:[%s2109_s13 + $0x24] sm:$0xf]  ;;  %v1558_v46 = vor.u32 %v1820_v41, %v1557_v40 }
  0x1e   : > { %v1559_v45 = vld [vmem:[%s2109_s13 + $0x28] sm:$0xf0]  ;;  %v1678_v47 = vor.u32 %v1849_v43, %v1677_v42  ;;  %v1848_v48 = vld [vmem:[%s623_s29 + $0x4] sm:$0xf]  ;;  %p616_p8 = scmp.lt.s32.totalorder %s615_s5, 15  ;;  %s1531_s16 = sshll.u32 %s2065_s23, 2 }
  0x1f   : > { %500 = vmatpush.bf16.msra.mxu0 %v2072_v8  ;;  %1857 = vmatpush.bf16.msra.mxu2 %v2072_v8  ;;  %v1679_v49 = vld [vmem:[%s623_s29 + $0x8] sm:$0xf0]  ;;  %v1562_v50 = vor.u32 %v1819_v44, %v1559_v45  ;;  %v1565_v52 = vld [vmem:[%s2109_s13 + $0x30] sm:$0xf]  ;;  %v1822_v53 = vld [vmem:[%s2109_s13 + $0x34] sm:$0xf0]  ;;  %s2219_s11 = scalar_lea.vmem %s3000_s3, %s1531_s16  ;;  %s2393_s15 = scalar_lea.vmem %s3001_s4, %s1531_s16 }
  0x20   : > { %549 = vmatpush.bf16.msra.mxu1 %v2079_v9  ;;  %1865 = vmatpush.bf16.msra.mxu3 %v2079_v9  ;;  %v1682_v51 = vor.u32 %v1848_v48, %v1679_v49  ;;  %s3052_s5 = smov (!%p616_p8, %s615_s5), 15  ;;  %v1821_v54 = vld [vmem:[%s2109_s13 + $0x34] sm:$0xf]  ;;  %v1567_v55 = vld [vmem:[%s2109_s13 + $0x38] sm:$0xf0]  ;;  %v1566_v56 = vor.u32 %v1822_v53, %v1565_v52  ;;  %v2211_v18 = vshrl.u32 %v713_v16, 7 }
  0x21   : > { %v1570_v57 = vor.u32 %v1821_v54, %v1567_v55  ;;  %s1670_s30 = sshll.u32 %s3052_s5, 4  ;;  %v2226_v29 = vld [vmem:[%s2219_s11 + $0x20] sm:$0xff]   ;;  %v2229_v30 = vld [vmem:[%s2219_s11 + $0x28] sm:$0xff]   ;;  %v2232_v31 = vld [vmem:[%s2219_s11 + $0x18] sm:$0xff]  }
  0x22   : > { %s630_s6 = scalar_lea.vmem %s2098_s9, %s1670_s30  ;;  %vm716_vm0 = vcmp.eq.s32.totalorder %v2211_v18, 0  ;;  %vm734_vm1 = vcmp.lt.s32.totalorder %v2211_v18, 1  ;;  %vm785_vm2 = vcmp.lt.s32.totalorder %v2211_v18, 7  ;;  %v1104_v40 = vunpack.c.l.bf16 %v2232_v31  ;;  %v2259_v55 = vld [vmem:[%s2219_s11 + $0x10] sm:$0xff]  }
  0x23   : > { %501 = vmatpush.bf16.msra.mxu0 %v2086_v10  ;;  %1858 = vmatpush.bf16.msra.mxu2 %v2086_v10  ;;  %v1685_v58 = vld [vmem:[%s630_s6] sm:$0xf]  ;;  %v1852_v59 = vld [vmem:[%s630_s6 + $0x4] sm:$0xf0]  ;;  %v1851_v61 = vld [vmem:[%s630_s6 + $0x4] sm:$0xf]  ;;  %v1232_v44 = vunpack.c.h.bf16 %v2226_v29 }
  0x24   : > { %550 = vmatpush.bf16.msra.mxu1 %v2093_v11  ;;  %1866 = vmatpush.bf16.msra.mxu3 %v2093_v11  ;;  %v1686_v60 = vor.u32 %v1852_v59, %v1685_v58  ;;  %v1687_v62 = vld [vmem:[%s630_s6 + $0x8] sm:$0xf0] }
  0x25   : > { %v1690_v63 = vor.u32 %v1851_v61, %v1687_v62 }
  0x27   : > { %502 = vmatpush.bf16.msra.mxu0 %v2106_v12  ;;  %1859 = vmatpush.bf16.msra.mxu2 %v2106_v12 }
  0x28   : > { %551 = vmatpush.bf16.msra.mxu1 %v2116_v13  ;;  %1867 = vmatpush.bf16.msra.mxu3 %v2116_v13 }
  0x2b   : > { %503 = vmatpush.bf16.msra.mxu0 %v2121_v14  ;;  %1860 = vmatpush.bf16.msra.mxu2 %v2121_v14 }
  0x2c   : > { %552 = vmatpush.bf16.msra.mxu1 %v2134_v19  ;;  %1868 = vmatpush.bf16.msra.mxu3 %v2134_v19 }
  0x2e   : > { %504 = vmatmul.bf16.vlgmr.msra.gmra.mxu0 %v1542_v24  ;;  %534 = vmatmul.bf16.vlgmr.msra.gmra.mxu2 %v1590_v25 }
  0x2f   : > { %643 = vmatpush.bf16.msrb.mxu2 %v2011_v0  ;;  %553 = vmatmul.bf16.vlgmr.msra.gmra.mxu1 %v1546_v26  ;;  %v2223_v26 = vadd.s32 8, %v2211_v18 }
  0x30   : > { %657 = vmatpush.bf16.msrb.mxu3 %v2016_v1 }
  0x31   : > { %583 = vmatmul.bf16.vlgmr.msra.gmra.mxu3 %v1594_v27  ;;  %vm768_vm3 = vcmp.eq.s32.totalorder %v2223_v26, 15 }
  0x33   : > { %644 = vmatpush.bf16.msrb.mxu2 %v2023_v2 }
  0x34   : > { %658 = vmatpush.bf16.msrb.mxu3 %v2030_v3 }
  0x37   : > { %645 = vmatpush.bf16.msrb.mxu2 %v2041_v4 }
  0x38   : > { %659 = vmatpush.bf16.msrb.mxu3 %v2048_v5 }
  0x3b   : > { %646 = vmatpush.bf16.msrb.mxu2 %v2056_v6 }
  0x3c   : > { %660 = vmatpush.bf16.msrb.mxu3 %v2063_v7 }
  0x3e   : > { %509 = vmatmul.bf16.gmra.mxu0 %v1550_v36  ;;  %539 = vmatmul.bf16.gmra.mxu2 %v1598_v37 }
  0x3f   : > { %647 = vmatpush.bf16.msrb.mxu2 %v2072_v8  ;;  %558 = vmatmul.bf16.gmra.mxu1 %v1554_v38  ;;  %v999_v38 = vunpack.c.l.bf16 %v2226_v29 }
  0x40   : > { %661 = vmatpush.bf16.msrb.mxu3 %v2079_v9 }
  0x41   : > { %588 = vmatmul.bf16.gmra.mxu3 %v1602_v39  ;;  %v1000_v39 = vunpack.c.l.bf16 %v2229_v30 }
  0x43   : > { %648 = vmatpush.bf16.msrb.mxu2 %v2086_v10 }
  0x44   : > { %662 = vmatpush.bf16.msrb.mxu3 %v2093_v11 }
  0x47   : > { %649 = vmatpush.bf16.msrb.mxu2 %v2106_v12 }
  0x48   : > { %663 = vmatpush.bf16.msrb.mxu3 %v2116_v13 }
  0x4b   : > { %650 = vmatpush.bf16.msrb.mxu2 %v2121_v14 }
  0x4c   : > { %664 = vmatpush.bf16.msrb.mxu3 %v2134_v19 }
  0x4e   : > { %514 = vmatmul.bf16.gmra.mxu0 %v1558_v46  ;;  %651 = vmatmul.bf16.vlgmr.msrb.gmra.mxu2 %v1678_v47 }
  0x4f   : > { %683 = vmatpush.bf16.msra.mxu2 %v2011_v0  ;;  %563 = vmatmul.bf16.gmra.mxu1 %v1562_v50  ;;  %v1573_v0 = vld [vmem:[%s2109_s13 + $0x40] sm:$0xf] }
  0x50   : > { %697 = vmatpush.bf16.msra.mxu3 %v2016_v1  ;;  %v1824_v1 = vld [vmem:[%s2109_s13 + $0x44] sm:$0xf0] }
  0x51   : > { %665 = vmatmul.bf16.vlgmr.msrb.gmra.mxu3 %v1682_v51 }
  0x53   : > { %684 = vmatpush.bf16.msra.mxu2 %v2023_v2  ;;  %v1823_v2 = vld [vmem:[%s2109_s13 + $0x44] sm:$0xf] }
  0x54   : > { %698 = vmatpush.bf16.msra.mxu3 %v2030_v3  ;;  %v1575_v3 = vld [vmem:[%s2109_s13 + $0x48] sm:$0xf0] }
  0x57   : > { %685 = vmatpush.bf16.msra.mxu2 %v2041_v4  ;;  %v1574_v4 = vor.u32 %v1824_v1, %v1573_v0 }
  0x58   : > { %699 = vmatpush.bf16.msra.mxu3 %v2048_v5  ;;  %v1578_v5 = vor.u32 %v1823_v2, %v1575_v3  ;;  %v1103_v3 = vunpack.c.l.bf16 %v2259_v55 }
  0x5b   : > { %686 = vmatpush.bf16.msra.mxu2 %v2056_v6  ;;  %v1581_v6 = vld [vmem:[%s2109_s13 + $0x50] sm:$0xf] }
  0x5c   : > { %700 = vmatpush.bf16.msra.mxu3 %v2063_v7  ;;  %v1826_v7 = vld [vmem:[%s2109_s13 + $0x54] sm:$0xf0] }
  0x5e   : > { %519 = vmatmul.bf16.gmra.mxu0 %v1566_v56 }
  0x5f   : > { %687 = vmatpush.bf16.msra.mxu2 %v2072_v8  ;;  %568 = vmatmul.bf16.gmra.mxu1 %v1570_v57  ;;  %v1825_v8 = vld [vmem:[%s2109_s13 + $0x54] sm:$0xf] }
  0x60   : > { %701 = vmatpush.bf16.msra.mxu3 %v2079_v9  ;;  %v1583_v9 = vld [vmem:[%s2109_s13 + $0x58] sm:$0xf0] }
  0x63   : > { %688 = vmatpush.bf16.msra.mxu2 %v2086_v10  ;;  %v1582_v10 = vor.u32 %v1826_v7, %v1581_v6 }
  0x64   : > { %702 = vmatpush.bf16.msra.mxu3 %v2093_v11  ;;  %v1586_v11 = vor.u32 %v1825_v8, %v1583_v9 }
  0x67   : > { %689 = vmatpush.bf16.msra.mxu2 %v2106_v12  ;;  %v2207_v12 = vld [vmem:[%s2999_s2] ss:$0 sm:$0xff] }
  0x68   : > { %703 = vmatpush.bf16.msra.mxu3 %v2116_v13 }
  0x6b   : > { %690 = vmatpush.bf16.msra.mxu2 %v2121_v14 }
  0x6c   : > { %704 = vmatpush.bf16.msra.mxu3 %v2134_v19 }
  0x6e   : > { %691 = vmatmul.bf16.vlgmr.msra.gmra.mxu2 %v1686_v60  ;;  %524 = vmatmul.bf16.gmra.mxu0 %v1574_v4  ;;  %v1233_v4 = vunpack.c.h.bf16 %v2229_v30  ;;  %v2415_v30 = vld [vmem:[%s2219_s11 + $0x48] sm:$0xff]  }
  0x6f   : > { %705 = vmatmul.bf16.vlgmr.msra.gmra.mxu3 %v1690_v63  ;;  %573 = vmatmul.bf16.gmra.mxu1 %v1578_v5 }
  0x7e   : > { %529 = vmatmul.bf16.gmra.mxu0 %v1582_v10 }
  0x7f   : > { %578 = vmatmul.bf16.gmra.mxu1 %v1586_v11  ;;  %v1334_v11 = vunpack.c.h.bf16 %v2259_v55 }
  0xab   : > { %v505_v13 = vpop.f32.mrf.mxu0 }
  0xac   : > { %v506_v14 = vadd.f32 %v2207_v12, %v505_v13  ;;  %v554_v15 = vpop.f32.mrf.mxu1  ;;  %v1335_v13 = vunpack.c.h.bf16 %v2232_v31 }
  0xae   : > { %v555_v17 = vadd.f32 %v554_v15, %v506_v14 }
  0xb0   : > { %v594_v23 = vmax.f32 %v555_v17, 0.0 }
  0xb1   : > { %v535_v19 = vpop.f32.mrf.mxu2 }
  0xb2   : > { %v536_v20 = vadd.f32 %v2207_v12, %v535_v19  ;;  %v718_v33 = vrot.slane %v594_v23, 7  ;;  %v769_v34 = vrot.slane %v594_v23, 1  ;;  %v834_v36 = vmul.f32 0.75, %v594_v23 }
  0xb3   : > { %v507_v21 = vpop.f32.mrf.mxu0 }
  0xb4   : > { %v584_v22 = vpop.f32.mrf.mxu3  ;;  %v508_v24 = vadd.f32 %v2207_v12, %v507_v21  ;;  %v556_v25 = vpop.f32.mrf.mxu1 }
  0xb5   : > { %v585_v27 = vadd.f32 %v584_v22, %v536_v20 }
  0xb6   : > { %v557_v28 = vadd.f32 %v556_v25, %v508_v24 }
  0xb7   : > { %v2237_v32 = vmax.f32 %v585_v27, 0.0 }
  0xb8   : > { %v595_v35 = vmax.f32 %v557_v28, 0.0 }
  0xb9   : > { %v537_v37 = vpop.f32.mrf.mxu2  ;;  %v724_v46 = vrot.slane %v2237_v32, 7  ;;  %v775_v47 = vrot.slane %v2237_v32, 1  ;;  %v2248_v48 = vmul.f32 0.75, %v2237_v32 }
  0xba   : > { %v726_v41 = vrot.slane %v595_v35, 7  ;;  %v777_v42 = vrot.slane %v595_v35, 1  ;;  %v538_v43 = vadd.f32 %v2207_v12, %v537_v37  ;;  %v835_v45 = vmul.f32 0.75, %v595_v35 }
  0xbb   : > { %v510_v49 = vpop.f32.mrf.mxu0 }
  0xbc   : > { %v735_v50 = vsel %vm734_vm1, %v718_v33, %v726_v41  ;;  %v743_v51 = vsel %vm734_vm1, %v726_v41, %v718_v33  ;;  %v786_v52 = vsel %vm785_vm2, %v769_v34, %v777_v42  ;;  %v794_v53 = vsel %vm785_vm2, %v777_v42, %v769_v34  ;;  %v559_v54 = vpop.f32.mrf.mxu1  ;;  %v586_v60 = vpop.f32.mrf.mxu3 }
  0xbd   : > { %v751_v56 = vsel %vm716_vm0, %v594_v23, %v743_v51  ;;  %v803_v57 = vsel %vm768_vm3, %v595_v35, %v794_v53  ;;  %v819_v58 = vmul.f32 0.25, %v735_v50  ;;  %v866_v59 = vmul.f32 0.25, %v786_v52 }
  0xbe   : > { %v818_v61 = vmul.f32 0.25, %v751_v56  ;;  %v867_v62 = vmul.f32 0.25, %v803_v57  ;;  %v511_v63 = vadd.f32 %v2207_v12, %v510_v49  ;;  %v587_v0 = vadd.f32 %v586_v60, %v538_v43  ;;  %v2302_v56 = vld [vmem:[%s2219_s11 + $0xe0] sm:$0xff]  }
  0xbf   : > { %v851_v1 = vadd.f32 %v835_v45, %v819_v58  ;;  %v882_v2 = vadd.f32 %v866_v59, %v834_v36 }
  0xc0   : > { %v850_v5 = vadd.f32 %v834_v36, %v818_v61  ;;  %v883_v6 = vadd.f32 %v867_v62, %v835_v45  ;;  %v560_v7 = vadd.f32 %v559_v54, %v511_v63  ;;  %v607_v8 = vmax.f32 %v587_v0, 0.0 }
  0xc1   : > { %v2268_v9 = vmul.f32 0.25, %v851_v1  ;;  %v2270_v10 = vmul.f32 0.75, %v851_v1  ;;  %v2278_v16 = vmul.f32 0.25, %v882_v2  ;;  %v2280_v17 = vmul.f32 0.75, %v882_v2  ;;  %v540_v23 = vpop.f32.mrf.mxu2 }
  0xc2   : > { %v2274_v14 = vmul.f32 0.25, %v850_v5  ;;  %v2276_v15 = vmul.f32 0.75, %v850_v5  ;;  %v2282_v19 = vmul.f32 0.25, %v883_v6  ;;  %v596_v20 = vmax.f32 %v560_v7, 0.0 }
  0xc3   : > { %v732_v21 = vrot.slane %v607_v8, 7  ;;  %v783_v22 = vrot.slane %v607_v8, 1  ;;  %v512_v24 = vpop.f32.mrf.mxu0  ;;  %v2284_v25 = vmul.f32 0.75, %v883_v6  ;;  %v847_v27 = vmul.f32 0.75, %v607_v8 }
  0xc4   : > { %v541_v28 = vadd.f32 %v2207_v12, %v540_v23  ;;  %v513_v33 = vadd.f32 %v2207_v12, %v512_v24  ;;  %v719_v34 = vrot.slane %v596_v20, 7  ;;  %v770_v35 = vrot.slane %v596_v20, 1  ;;  %v561_v49 = vpop.f32.mrf.mxu1  ;;  %v589_v54 = vpop.f32.mrf.mxu3 }
  0xc5   : > { %v836_v36 = vmul.f32 0.75, %v596_v20  ;;  %v741_v37 = vsel %vm734_vm1, %v724_v46, %v732_v21  ;;  %v749_v41 = vsel %vm734_vm1, %v732_v21, %v724_v46  ;;  %v792_v42 = vsel %vm785_vm2, %v775_v47, %v783_v22  ;;  %v2305_v46 = vld [vmem:[%s2219_s11 + $0xe8] sm:$0xff]  }
  0xc6   : > { %v800_v43 = vsel %vm785_vm2, %v783_v22, %v775_v47  ;;  %v831_v45 = vmul.f32 0.25, %v741_v37  ;;  %v763_v50 = vsel %vm716_vm0, %v2237_v32, %v749_v41  ;;  %v878_v52 = vmul.f32 0.25, %v792_v42  ;;  %v2336_v42 = vld [vmem:[%s2219_s11 + $0xd0] sm:$0xff]  }
  0xc7   : > { %v815_v51 = vsel %vm768_vm3, %v607_v8, %v800_v43  ;;  %v562_v53 = vadd.f32 %v561_v49, %v513_v33  ;;  %v830_v57 = vmul.f32 0.25, %v763_v50  ;;  %v590_v47 = vadd.f32 %v589_v54, %v541_v28 }
  0xc8   : > { %v863_v58 = vadd.f32 %v847_v27, %v831_v45  ;;  %v879_v59 = vmul.f32 0.25, %v815_v51  ;;  %v894_v60 = vadd.f32 %v878_v52, %v2248_v48  ;;  %v1011_v62 = vunpack.c.l.bf16 %v2302_v56 }
  0xc9   : > { %v597_v61 = vmax.f32 %v562_v53, 0.0  ;;  %v1012_v32 = vunpack.c.l.bf16 %v2305_v46  ;;  %v862_v63 = vadd.f32 %v2248_v48, %v830_v57  ;;  %v542_v37 = vpop.f32.mrf.mxu2  ;;  %v2342_v53 = vmax.f32 %v590_v47, 0.0 }
  0xca   : > { %v895_v0 = vadd.f32 %v879_v59, %v847_v27  ;;  %v2311_v1 = vmul.f32 0.25, %v863_v58  ;;  %v2313_v2 = vmul.f32 0.75, %v863_v58  ;;  %v2315_v5 = vmul.f32 0.25, %v894_v60 }
  0xcb   : > { %v2317_v6 = vmul.f32 0.75, %v894_v60  ;;  %v727_v7 = vrot.slane %v597_v61, 7  ;;  %v778_v8 = vrot.slane %v597_v61, 1  ;;  %v2319_v21 = vmul.f32 0.25, %v862_v63  ;;  %v515_v41 = vpop.f32.mrf.mxu0 }
  0xcc   : > { %v2321_v22 = vmul.f32 0.75, %v862_v63  ;;  %v2323_v23 = vmul.f32 0.25, %v895_v0  ;;  %v2325_v24 = vmul.f32 0.75, %v895_v0  ;;  %v837_v50 = vmul.f32 0.75, %v597_v61 }
  0xcd   : > { %v736_v48 = vsel %vm734_vm1, %v719_v34, %v727_v7  ;;  %v744_v27 = vsel %vm734_vm1, %v727_v7, %v719_v34  ;;  %v787_v28 = vsel %vm785_vm2, %v770_v35, %v778_v8  ;;  %v795_v33 = vsel %vm785_vm2, %v778_v8, %v770_v35 }
  0xce   : > { %3003 = vst [vmem:[#allocation2_spill] sm:$0xff] %v2323_v23  ;;  %v753_v43 = vsel %vm716_vm0, %v596_v20, %v744_v27  ;;  %v805_v45 = vsel %vm768_vm3, %v597_v61, %v795_v33  ;;  %v821_v49 = vmul.f32 0.25, %v736_v48  ;;  %v868_v34 = vmul.f32 0.25, %v787_v28 }
  0xcf   : > { %v820_v51 = vmul.f32 0.25, %v753_v43  ;;  %v869_v52 = vmul.f32 0.25, %v805_v45  ;;  %v543_v35 = vadd.f32 %v2207_v12, %v542_v37  ;;  %v516_v57 = vadd.f32 %v2207_v12, %v515_v41  ;;  %v564_v43 = vpop.f32.mrf.mxu1 }
  0xd0   : > { %v853_v54 = vadd.f32 %v837_v50, %v821_v49  ;;  %v1115_v58 = vunpack.c.l.bf16 %v2336_v42  ;;  %v884_v60 = vadd.f32 %v868_v34, %v836_v36  ;;  %v725_v63 = vrot.slane %v2342_v53, 7 }
  0xd1   : > { %v852_v59 = vadd.f32 %v836_v36, %v820_v51  ;;  %v885_v20 = vadd.f32 %v869_v52, %v837_v50  ;;  %v776_v7 = vrot.slane %v2342_v53, 1  ;;  %v2354_v47 = vmul.f32 0.75, %v2342_v53 }
  0xd2   : > { %v2348_v0 = vmul.f32 0.25, %v853_v54  ;;  %v2350_v61 = vmul.f32 0.75, %v853_v54  ;;  %v2360_v27 = vmul.f32 0.25, %v884_v60  ;;  %v2368_v37 = vmul.f32 0.75, %v884_v60 }
  0xd3   : > { %v2356_v8 = vmul.f32 0.25, %v852_v59  ;;  %v2358_v48 = vmul.f32 0.75, %v852_v59  ;;  %v2362_v36 = vmul.f32 0.25, %v885_v20  ;;  %v2370_v41 = vmul.f32 0.75, %v885_v20  ;;  %v517_v29 = vpop.f32.mrf.mxu0 }
  0xd4   : > { %v971_v28 = vadd.f32 %v2350_v61, %v2268_v9  ;;  %v1075_v33 = vadd.f32 %v2270_v10, %v2348_v0  ;;  %v1306_v50 = vadd.f32 %v2280_v17, %v2360_v27  ;;  %v1204_v52 = vadd.f32 %v2368_v37, %v2278_v16 }
  0xd5   : > { %v970_v45 = vadd.f32 %v2358_v48, %v2274_v14  ;;  %v1074_v49 = vadd.f32 %v2276_v15, %v2356_v8  ;;  %v1307_v9 = vadd.f32 %v2284_v25, %v2362_v36  ;;  %v1205_v14 = vadd.f32 %v2370_v41, %v2282_v19  ;;  %v591_v19 = vpop.f32.mrf.mxu3 }
  0xd6   : > { %v1014_v51 = vadd.f32 %v1000_v39, %v971_v28  ;;  %v1118_v34 = vadd.f32 %v1104_v40, %v1075_v33  ;;  %v1348_v40 = vadd.f32 %v1334_v11, %v1306_v50  ;;  %v1246_v20 = vadd.f32 %v1232_v44, %v1204_v52  ;;  %v2412_v44 = vld [vmem:[%s2219_s11 + $0x40] sm:$0xff]  }
  0xd7   : > { %v1013_v54 = vadd.f32 %v999_v38, %v970_v45  ;;  %v1117_v39 = vadd.f32 %v1103_v3, %v1074_v49  ;;  %v1349_v16 = vadd.f32 %v1335_v13, %v1307_v9  ;;  %v1247_v38 = vadd.f32 %v1233_v4, %v1205_v14  ;;  %v2408_v3 = vld [vmem:[%s2219_s11 + $0xd8] sm:$0xff]   ;;  %v2418_v4 = vld [vmem:[%s2219_s11 + $0x30] sm:$0xff]  }
  0xd8   : > { %v1028_v59 = vpack.c.bf16 %v1014_v51, %v1014_v51  ;;  %v1132_v60 = vpack.c.bf16 %v1118_v34, %v1118_v34  ;;  %v1362_v28 = vpack.c.bf16 %v1348_v40, %v1348_v40  ;;  %v1260_v13 = vpack.c.bf16 %v1246_v20, %v1246_v20 }
  0xd9   : > { %v1027_v55 = vpack.c.bf16 %v1013_v54, %v1013_v54  ;;  %v1131_v11 = vpack.c.bf16 %v1117_v39, %v1117_v39  ;;  %v1363_v31 = vpack.c.bf16 %v1349_v16, %v1349_v16  ;;  %v1261_v33 = vpack.c.bf16 %v1247_v38, %v1247_v38  ;;  %v2433_v54 = vld [vmem:[%s2219_s11 + $0x38] sm:$0xff]  }
  0xda   : > { %1706 = vst [vmem:[%s2393_s15 + $0x28] sm:$0xf] %v1028_v59  ;;  %v565_v45 = vadd.f32 %v564_v43, %v516_v57  ;;  %v592_v49 = vadd.f32 %v591_v19, %v543_v35  ;;  %v1116_v50 = vunpack.c.l.bf16 %v2408_v3  ;;  %v1244_v9 = vunpack.c.h.bf16 %v2302_v56  ;;  %v652_v35 = vpop.f32.mrf.mxu2 }
  0xdb   : > { %1705 = vst [vmem:[%s2393_s15 + $0x20] sm:$0xf] %v1027_v55  ;;  %v1245_v51 = vunpack.c.h.bf16 %v2305_v46  ;;  %v1346_v57 = vunpack.c.h.bf16 %v2336_v42  ;;  %v2430_v14 = vadd.f32 %v2207_v12, %v652_v35  ;;  %v518_v39 = vadd.f32 %v2207_v12, %v517_v29 }
  0xdc   : > { %1733 = vst [vmem:[%s2393_s15 + $0x10] sm:$0xf] %v1131_v11  ;;  %v2426_v43 = vmax.f32 %v565_v45, 0.0  ;;  %v609_v34 = vmax.f32 %v592_v49, 0.0 }
  0xdd   : > { %1734 = vst [vmem:[%s2393_s15 + $0x18] sm:$0xf] %v1132_v60  ;;  %v566_v60 = vpop.f32.mrf.mxu1 }
  0xde   : > { %1765 = vst [vmem:[%s2393_s15 + $0x24] sm:$0xf] %v1260_v13  ;;  %v2444_v38 = vmul.f32 0.75, %v2426_v43  ;;  %v733_v55 = vrot.slane %v609_v34, 7  ;;  %v784_v11 = vrot.slane %v609_v34, 1  ;;  %v849_v45 = vmul.f32 0.75, %v609_v34 }
  0xdf   : > { %1766 = vst [vmem:[%s2393_s15 + $0x2c] sm:$0xf] %v1261_v33  ;;  %v567_v49 = vadd.f32 %v566_v60, %v518_v39 }
  0xe0   : > { %1793 = vst [vmem:[%s2393_s15 + $0x14] sm:$0xf] %v1362_v28  ;;  %v742_v13 = vsel %vm734_vm1, %v725_v63, %v733_v55  ;;  %v750_v35 = vsel %vm734_vm1, %v733_v55, %v725_v63  ;;  %v793_v28 = vsel %vm785_vm2, %v776_v7, %v784_v11  ;;  %v801_v60 = vsel %vm785_vm2, %v784_v11, %v776_v7 }
  0xe1   : > { %1794 = vst [vmem:[%s2393_s15 + $0x1c] sm:$0xf] %v1363_v31  ;;  %v765_v39 = vsel %vm716_vm0, %v2342_v53, %v750_v35  ;;  %v833_v63 = vmul.f32 0.25, %v742_v13  ;;  %v817_v55 = vsel %vm768_vm3, %v609_v34, %v801_v60  ;;  %v880_v31 = vmul.f32 0.25, %v793_v28 }
  0xe2   : > { %v832_v33 = vmul.f32 0.25, %v765_v39  ;;  %v599_v19 = vmax.f32 %v567_v49, 0.0  ;;  %v881_v29 = vmul.f32 0.25, %v817_v55 }
  0xe3   : > { %v865_v40 = vadd.f32 %v849_v45, %v833_v63  ;;  %v896_v53 = vadd.f32 %v880_v31, %v2354_v47 }
  0xe4   : > { %v864_v20 = vadd.f32 %v2354_v47, %v832_v33  ;;  %v728_v59 = vrot.slane %v599_v19, 7  ;;  %v779_v52 = vrot.slane %v599_v19, 1  ;;  %v897_v7 = vadd.f32 %v881_v29, %v849_v45 }
  0xe5   : > { %v2477_v11 = vmul.f32 0.75, %v865_v40  ;;  %v1073_v13 = vmul.f32 0.25, %v865_v40  ;;  %v839_v34 = vmul.f32 0.75, %v599_v19  ;;  %v2481_v28 = vmul.f32 0.75, %v896_v53 }
  0xe6   : > { %v2479_v39 = vmul.f32 0.75, %v864_v20  ;;  %v1072_v49 = vmul.f32 0.25, %v864_v20  ;;  %v1304_v60 = vmul.f32 0.25, %v896_v53  ;;  %v2486_v55 = vmul.f32 0.75, %v897_v7 }
  0xe7   : > { %v983_v63 = vadd.f32 %v2477_v11, %v2311_v1  ;;  %v1087_v33 = vadd.f32 %v1073_v13, %v2313_v2  ;;  %v1305_v47 = vmul.f32 0.25, %v897_v7  ;;  %v1216_v29 = vadd.f32 %v2481_v28, %v2315_v5 }
  0xe8   : > { %v982_v45 = vadd.f32 %v2479_v39, %v2319_v21  ;;  %v1086_v40 = vadd.f32 %v1072_v49, %v2321_v22  ;;  %v1318_v20 = vadd.f32 %v1304_v60, %v2317_v6  ;;  %v1217_v7 = vadd.f32 %v2486_v55, %v2323_v23  ;;  %v520_v23 = vpop.f32.mrf.mxu0 }
  0xe9   : > { %v1026_v31 = vadd.f32 %v1012_v32, %v983_v63  ;;  %v1130_v53 = vadd.f32 %v1116_v50, %v1087_v33  ;;  %v1319_v13 = vadd.f32 %v1305_v47, %v2325_v24  ;;  %v1258_v60 = vadd.f32 %v1244_v9, %v1216_v29 }
  0xea   : > { %v1025_v49 = vadd.f32 %v1011_v62, %v982_v45  ;;  %v1129_v16 = vadd.f32 %v1115_v58, %v1086_v40  ;;  %v1360_v32 = vadd.f32 %v1346_v57, %v1318_v20  ;;  %v1259_v33 = vadd.f32 %v1245_v51, %v1217_v7  ;;  %v654_v40 = vpop.f32.mrf.mxu2  ;;  %v666_v7 = vpop.f32.mrf.mxu3 }
  0xeb   : > { %v1040_v50 = vpack.c.bf16 %v1026_v31, %v1026_v31  ;;  %v1144_v63 = vpack.c.bf16 %v1130_v53, %v1130_v53  ;;  %v3004_v47 = vunpack.c.h.bf16 %v2408_v3  ;;  %v1272_v58 = vpack.c.bf16 %v1258_v60, %v1258_v60 }
  0xec   : > { %v1039_v62 = vpack.c.bf16 %v1025_v49, %v1025_v49  ;;  %v1143_v45 = vpack.c.bf16 %v1129_v16, %v1129_v16  ;;  %v1374_v56 = vpack.c.bf16 %v1360_v32, %v1360_v32  ;;  %v1273_v9 = vpack.c.bf16 %v1259_v33, %v1259_v33 }
  0xed   : > { %v1361_v35 = vadd.f32 %v3004_v47, %v1319_v13  ;;  %1718 = vst [vmem:[%s2393_s15 + $0xe8] sm:$0xf] %v1040_v50  ;;  %v3005_v57 = vrot.slane %v2426_v43, 7  ;;  %v3007_v29 = vrot.slane %v2426_v43, 1  ;;  %v667_v32 = vadd.f32 %v666_v7, %v2430_v14 }
  0xee   : > { %1717 = vst [vmem:[%s2393_s15 + $0xe0] sm:$0xf] %v1039_v62  ;;  %v655_v33 = vadd.f32 %v2207_v12, %v654_v40 }
  0xef   : > { %v1375_v42 = vpack.c.bf16 %v1361_v35, %v1361_v35  ;;  %v737_v46 = vsel %vm734_vm1, %v3005_v57, %v728_v59  ;;  %v3006_v51 = vmov %v3005_v57  ;;  %v788_v35 = vsel %vm785_vm2, %v3007_v29, %v779_v52  ;;  %1745 = vst [vmem:[%s2393_s15 + $0xd0] sm:$0xf] %v1143_v45 }
  0xf0   : > { %v745_v3 = vsel %vm734_vm1, %v728_v59, %v3006_v51  ;;  %v3008_v20 = vmov %v3007_v29  ;;  %v823_v53 = vmul.f32 0.25, %v737_v46  ;;  %v2535_v59 = vld [vmem:[%s2219_s11] sm:$0xff]   ;;  %v870_v60 = vmul.f32 0.25, %v788_v35  ;;  %1746 = vst [vmem:[%s2393_s15 + $0xd8] sm:$0xf] %v1144_v63 }
  0xf1   : > { %v755_v16 = vsel %vm716_vm0, %v2426_v43, %v745_v3  ;;  %v796_v31 = vsel %vm785_vm2, %v779_v52, %v3008_v20  ;;  %v521_v52 = vadd.f32 %v2207_v12, %v520_v23  ;;  %1777 = vst [vmem:[%s2393_s15 + $0xe4] sm:$0xf] %v1272_v58  ;;  %v2547_v45 = vmax.f32 %v667_v32, 0.0 }
  0xf2   : > { %v807_v13 = vsel %vm768_vm3, %v599_v19, %v796_v31  ;;  %v822_v49 = vmul.f32 0.25, %v755_v16  ;;  %v855_v50 = vadd.f32 %v839_v34, %v823_v53  ;;  %v886_v62 = vadd.f32 %v870_v60, %v2444_v38  ;;  %v569_v19 = vpop.f32.mrf.mxu1  ;;  %1778 = vst [vmem:[%s2393_s15 + $0xec] sm:$0xf] %v1273_v9 }
  0xf3   : > { %v871_v43 = vmul.f32 0.25, %v807_v13  ;;  %v1064_v57 = vunpack.c.l.bf16 %v2535_v59  ;;  %v570_v51 = vadd.f32 %v569_v19, %v521_v52  ;;  %1805 = vst [vmem:[%s2393_s15 + $0xd4] sm:$0xf] %v1374_v56  ;;  %v3010_v31 = vunpack.c.l.bf16 %v2433_v54  ;;  %v668_v19 = vpop.f32.mrf.mxu3 }
  0xf4   : > { %v854_v47 = vadd.f32 %v2444_v38, %v822_v49  ;;  %v2551_v63 = vmul.f32 0.25, %v855_v50  ;;  %v2553_v46 = vmul.f32 0.75, %v855_v50  ;;  %v2560_v3 = vmul.f32 0.25, %v886_v62  ;;  %1806 = vst [vmem:[%s2393_s15 + $0xdc] sm:$0xf] %v1375_v42  ;;  %v522_v42 = vpop.f32.mrf.mxu0 }
  0xf5   : > { %v887_v14 = vadd.f32 %v871_v43, %v839_v34  ;;  %v2562_v38 = vmul.f32 0.75, %v886_v62  ;;  %v3013_v49 = vunpack.c.h.bf16 %v2412_v44  ;;  %v3014_v32 = vunpack.c.h.bf16 %v2418_v4 }
  0xf6   : > { %v2556_v23 = vmul.f32 0.25, %v854_v47  ;;  %v2558_v58 = vmul.f32 0.75, %v854_v47  ;;  %v973_v40 = vadd.f32 %v2553_v46, %v2348_v0  ;;  %v1077_v34 = vadd.f32 %v2350_v61, %v2551_v63 }
  0xf7   : > { %v2569_v9 = vmul.f32 0.25, %v887_v14  ;;  %v2571_v16 = vmul.f32 0.75, %v887_v14  ;;  %v1206_v35 = vadd.f32 %v2562_v38, %v2360_v27  ;;  %v1308_v0 = vadd.f32 %v2368_v37, %v2560_v3  ;;  %v2602_v14 = vld [vmem:[%s2219_s11 + $0x8] sm:$0xff]  }
  0xf8   : > { %v972_v56 = vadd.f32 %v2558_v58, %v2356_v8  ;;  %v1076_v29 = vadd.f32 %v2358_v48, %v2556_v23  ;;  %v3009_v61 = vunpack.c.l.bf16 %v2415_v30  ;;  %v1120_v53 = vadd.f32 %v3010_v31, %v1077_v34 }
  0xf9   : > { %v1207_v8 = vadd.f32 %v2571_v16, %v2362_v36  ;;  %v1309_v48 = vadd.f32 %v2370_v41, %v2569_v9  ;;  %v3011_v27 = vunpack.c.l.bf16 %v2412_v44  ;;  %v3012_v37 = vunpack.c.l.bf16 %v2418_v4 }
  0xfa   : > { %v1016_v20 = vadd.f32 %v3009_v61, %v973_v40  ;;  %v1248_v60 = vadd.f32 %v3013_v49, %v1206_v35  ;;  %v1350_v50 = vadd.f32 %v3014_v32, %v1308_v0  ;;  %v1134_v36 = vpack.c.bf16 %v1120_v53, %v1120_v53  ;;  %v2611_v0 = vld [vmem:[%s2219_s11 + $0x68] sm:$0xff]   ;;  %v571_v32 = vpop.f32.mrf.mxu1 }
  0xfb   : > { %v1015_v7 = vadd.f32 %v3011_v27, %v972_v56  ;;  %v1119_v13 = vadd.f32 %v3012_v37, %v1076_v29  ;;  %v3015_v52 = vunpack.c.h.bf16 %v2415_v30  ;;  %v3016_v47 = vunpack.c.h.bf16 %v2433_v54  ;;  %v2605_v56 = vld [vmem:[%s2219_s11 + $0x60] sm:$0xff]  }
  0xfc   : > { %v1030_v43 = vpack.c.bf16 %v1016_v20, %v1016_v20  ;;  %v1262_v34 = vpack.c.bf16 %v1248_v60, %v1248_v60  ;;  %v1364_v4 = vpack.c.bf16 %v1350_v50, %v1350_v50  ;;  %v898_v35 = vrot.slane %v2547_v45, 7  ;;  %1736 = vst [vmem:[%s2393_s15 + $0x38] sm:$0xf] %v1134_v36 }
  0xfd   : > { %v1249_v41 = vadd.f32 %v3015_v52, %v1207_v8  ;;  %v1351_v62 = vadd.f32 %v3016_v47, %v1309_v48  ;;  %v1029_v40 = vpack.c.bf16 %v1015_v7, %v1015_v7  ;;  %v1133_v44 = vpack.c.bf16 %v1119_v13, %v1119_v13  ;;  %v2617_v8 = vld [vmem:[%s2219_s11 + $0x50] sm:$0xff]   ;;  %v2620_v48 = vld [vmem:[%s2219_s11 + $0x58] sm:$0xff]  }
  0xfe   : > { %1708 = vst [vmem:[%s2393_s15 + $0x48] sm:$0xf] %v1030_v43  ;;  %v904_v54 = vrot.slane %v2547_v45, 1  ;;  %v912_v61 = vmul.f32 0.75, %v2547_v45  ;;  %v600_v20 = vmax.f32 %v570_v51, 0.0  ;;  %v669_v31 = vadd.f32 %v668_v19, %v655_v33  ;;  %v525_v19 = vpop.f32.mrf.mxu0 }
  0xff   : > { %v1263_v29 = vpack.c.bf16 %v1249_v41, %v1249_v41  ;;  %v1365_v30 = vpack.c.bf16 %v1351_v62, %v1351_v62  ;;  %1707 = vst [vmem:[%s2393_s15 + $0x40] sm:$0xf] %v1029_v40  ;;  %v1065_v53 = vunpack.c.l.bf16 %v2602_v14  ;;  %v1296_v27 = vunpack.c.h.bf16 %v2535_v59 }
 0x100   : > { %1735 = vst [vmem:[%s2393_s15 + $0x30] sm:$0xf] %v1133_v44  ;;  %v1297_v7 = vunpack.c.h.bf16 %v2602_v14  ;;  %v523_v37 = vadd.f32 %v2207_v12, %v522_v42  ;;  %v721_v51 = vrot.slane %v600_v20, 7  ;;  %v772_v33 = vrot.slane %v600_v20, 1 }
 0x101   : > { %v2628_v49 = vmul.f32 0.75, %v600_v20  ;;  %v672_v60 = vmax.f32 %v669_v31, 0.0  ;;  %1767 = vst [vmem:[%s2393_s15 + $0x44] sm:$0xf] %v1262_v34  ;;  %v2655_v52 = vadd.f32 %v2207_v12, %v525_v19 }
 0x102   : > { %v572_v50 = vadd.f32 %v571_v32, %v523_v37  ;;  %1768 = vst [vmem:[%s2393_s15 + $0x4c] sm:$0xf] %v1263_v29 }
 0x103   : > { %v899_v42 = vrot.slane %v672_v60, 7  ;;  %v905_v47 = vrot.slane %v672_v60, 1  ;;  %v913_v36 = vmul.f32 0.75, %v672_v60  ;;  %1795 = vst [vmem:[%s2393_s15 + $0x34] sm:$0xf] %v1364_v4 }
 0x104   : > { %v601_v40 = vmax.f32 %v572_v50, 0.0  ;;  %1796 = vst [vmem:[%s2393_s15 + $0x3c] sm:$0xf] %v1365_v30 }
 0x105   : > { %v900_v37 = vsel %vm734_vm1, %v898_v35, %v899_v42  ;;  %v901_v29 = vsel %vm734_vm1, %v899_v42, %v898_v35  ;;  %v906_v32 = vsel %vm785_vm2, %v904_v54, %v905_v47  ;;  %v907_v4 = vsel %vm785_vm2, %v905_v47, %v904_v54 }
 0x106   : > { %v902_v50 = vsel %vm716_vm0, %v2547_v45, %v901_v29  ;;  %v909_v44 = vsel %vm768_vm3, %v672_v60, %v907_v4  ;;  %v911_v30 = vmul.f32 0.25, %v900_v37  ;;  %v916_v62 = vmul.f32 0.25, %v906_v32 }
 0x107   : > { %v910_v31 = vmul.f32 0.25, %v902_v50  ;;  %v917_v34 = vmul.f32 0.25, %v909_v44  ;;  %v729_v43 = vrot.slane %v601_v40, 7  ;;  %v780_v13 = vrot.slane %v601_v40, 1 }
 0x108   : > { %v915_v35 = vadd.f32 %v913_v36, %v911_v30  ;;  %v918_v42 = vadd.f32 %v916_v62, %v912_v61  ;;  %v841_v41 = vmul.f32 0.75, %v601_v40 }
 0x109   : > { %v914_v54 = vadd.f32 %v912_v61, %v910_v31  ;;  %v919_v47 = vadd.f32 %v917_v34, %v913_v36  ;;  %v738_v45 = vsel %vm734_vm1, %v721_v51, %v729_v43  ;;  %v746_v60 = vsel %vm734_vm1, %v729_v43, %v721_v51 }
 0x10a   : > { %v1057_v37 = vmul.f32 0.25, %v915_v35  ;;  %v1288_v29 = vmul.f32 0.25, %v918_v42  ;;  %v757_v44 = vsel %vm716_vm0, %v600_v20, %v746_v60  ;;  %v789_v62 = vsel %vm785_vm2, %v772_v33, %v780_v13  ;;  %v527_v35 = vpop.f32.mrf.mxu0  ;;  %v574_v42 = vpop.f32.mrf.mxu1 }
 0x10b   : > { %v1056_v32 = vmul.f32 0.25, %v914_v54  ;;  %v1289_v4 = vmul.f32 0.25, %v919_v47  ;;  %v797_v61 = vsel %vm785_vm2, %v780_v13, %v772_v33  ;;  %v824_v36 = vmul.f32 0.25, %v757_v44 }
 0x10c   : > { %v1061_v19 = vadd.f32 %v2270_v10, %v1057_v37  ;;  %v1292_v34 = vadd.f32 %v2280_v17, %v1288_v29  ;;  %v809_v51 = vsel %vm768_vm3, %v601_v40, %v797_v61  ;;  %v825_v43 = vmul.f32 0.25, %v738_v45 }
 0x10d   : > { %v1060_v31 = vadd.f32 %v2276_v15, %v1056_v32  ;;  %v1293_v20 = vadd.f32 %v2284_v25, %v1289_v4  ;;  %v856_v50 = vadd.f32 %v2628_v49, %v824_v36  ;;  %v872_v30 = vmul.f32 0.25, %v789_v62 }
 0x10e   : > { %v1067_v13 = vadd.f32 %v1065_v53, %v1061_v19  ;;  %v1298_v10 = vadd.f32 %v1296_v27, %v1292_v34  ;;  %v857_v33 = vadd.f32 %v841_v41, %v825_v43  ;;  %v873_v17 = vmul.f32 0.25, %v809_v51  ;;  %v692_v27 = vpop.f32.mrf.mxu2 }
 0x10f   : > { %v1066_v40 = vadd.f32 %v1064_v57, %v1060_v31  ;;  %v1299_v15 = vadd.f32 %v1297_v7, %v1293_v20  ;;  %v888_v25 = vadd.f32 %v872_v30, %v2628_v49  ;;  %v2683_v54 = vmul.f32 0.25, %v856_v50 }
 0x110   : > { %v1069_v47 = vpack.c.bf16 %v1067_v13, %v1067_v13  ;;  %v1300_v53 = vpack.c.bf16 %v1298_v10, %v1298_v10  ;;  %v889_v45 = vadd.f32 %v873_v17, %v841_v41  ;;  %v2685_v60 = vmul.f32 0.25, %v857_v33  ;;  %v706_v41 = vpop.f32.mrf.mxu3  ;;  %v2732_v17 = vld [vmem:[%s2219_s11 + $0x80] sm:$0xff]  }
 0x111   : > { %v1068_v37 = vpack.c.bf16 %v1066_v40, %v1066_v40  ;;  %v1301_v29 = vpack.c.bf16 %v1299_v15, %v1299_v15  ;;  %v2687_v44 = vmul.f32 0.75, %v856_v50  ;;  %v2689_v59 = vmul.f32 0.75, %v857_v33 }
 0x112   : > { %1071 = vst [vmem:[%s2393_s15 + $0x8] sm:$0xf] %v1069_v47  ;;  %v1078_v57 = vadd.f32 %v2558_v58, %v2683_v54  ;;  %v1079_v14 = vadd.f32 %v2553_v46, %v2685_v60  ;;  %v2696_v7 = vmul.f32 0.25, %v888_v25  ;;  %v2698_v49 = vmul.f32 0.25, %v889_v45 }
 0x113   : > { %1070 = vst [vmem:[%s2393_s15] sm:$0xf] %v1068_v37  ;;  %v974_v62 = vadd.f32 %v2687_v44, %v2556_v23  ;;  %v975_v32 = vadd.f32 %v2689_v59, %v2551_v63  ;;  %v2705_v4 = vmul.f32 0.75, %v888_v25  ;;  %v2707_v61 = vmul.f32 0.75, %v889_v45  ;;  %v530_v45 = vpop.f32.mrf.mxu0 }
 0x114   : > { %1302 = vst [vmem:[%s2393_s15 + $0x4] sm:$0xf] %v1300_v53  ;;  %v3017_v46 = vunpack.c.l.bf16 %v2617_v8  ;;  %v3018_v36 = vunpack.c.l.bf16 %v2620_v48  ;;  %v1310_v34 = vadd.f32 %v2562_v38, %v2696_v7  ;;  %v1311_v23 = vadd.f32 %v2571_v16, %v2698_v49  ;;  %v2739_v53 = vld [vmem:[%s2219_s11 + $0x88] sm:$0xff]  }
 0x115   : > { %1303 = vst [vmem:[%s2393_s15 + $0xc] sm:$0xf] %v1301_v29  ;;  %v3019_v63 = vunpack.c.l.bf16 %v2605_v56  ;;  %v3020_v43 = vunpack.c.l.bf16 %v2611_v0  ;;  %v1208_v20 = vadd.f32 %v2705_v4, %v2560_v3  ;;  %v1209_v50 = vadd.f32 %v2707_v61, %v2569_v9 }
 0x116   : > { %v1121_v58 = vadd.f32 %v3017_v46, %v1078_v57  ;;  %v1122_v19 = vadd.f32 %v3018_v36, %v1079_v14  ;;  %v3021_v13 = vunpack.c.h.bf16 %v2617_v8  ;;  %v3022_v10 = vunpack.c.h.bf16 %v2620_v48  ;;  %v2742_v8 = vld [vmem:[%s2219_s11 + $0x70] sm:$0xff]   ;;  %v576_v14 = vpop.f32.mrf.mxu1 }
 0x117   : > { %v1017_v51 = vadd.f32 %v3019_v63, %v974_v62  ;;  %v1018_v31 = vadd.f32 %v3020_v43, %v975_v32  ;;  %v3023_v25 = vunpack.c.h.bf16 %v2605_v56  ;;  %v3024_v47 = vunpack.c.h.bf16 %v2611_v0  ;;  %v2748_v56 = vld [vmem:[%s2219_s11 + $0x78] sm:$0xff]   ;;  %v2761_v63 = vld [vmem:[%s2219_s11 + $0xf0] sm:$0xff]  }
 0x118   : > { %v1135_v38 = vpack.c.bf16 %v1121_v58, %v1121_v58  ;;  %v1136_v30 = vpack.c.bf16 %v1122_v19, %v1122_v19  ;;  %v1352_v16 = vadd.f32 %v3021_v13, %v1310_v34  ;;  %v1353_v33 = vadd.f32 %v3022_v10, %v1311_v23 }
 0x119   : > { %v1031_v40 = vpack.c.bf16 %v1017_v51, %v1017_v51  ;;  %v1032_v15 = vpack.c.bf16 %v1018_v31, %v1018_v31  ;;  %v1250_v3 = vadd.f32 %v3023_v25, %v1208_v20  ;;  %v1251_v9 = vadd.f32 %v3024_v47, %v1209_v50  ;;  %v708_v20 = vpop.f32.mrf.mxu3 }
 0x11a   : > { %1737 = vst [vmem:[%s2393_s15 + $0x50] sm:$0xf] %v1135_v38  ;;  %v1366_v48 = vpack.c.bf16 %v1352_v16, %v1352_v16  ;;  %v1367_v37 = vpack.c.bf16 %v1353_v33, %v1353_v33  ;;  %v575_v29 = vadd.f32 %v574_v42, %v2655_v52  ;;  %v693_v57 = vadd.f32 %v2207_v12, %v692_v27  ;;  %v694_v27 = vpop.f32.mrf.mxu2  ;;  %v2771_v16 = vld [vmem:[%s2219_s11 + $0xf8] sm:$0xff]  }
 0x11b   : > { %1709 = vst [vmem:[%s2393_s15 + $0x60] sm:$0xf] %v1031_v40  ;;  %v1264_v0 = vpack.c.bf16 %v1250_v3, %v1250_v3  ;;  %v1265_v62 = vpack.c.bf16 %v1251_v9, %v1251_v9  ;;  %v528_v32 = vadd.f32 %v2207_v12, %v527_v35  ;;  %v1005_v46 = vunpack.c.l.bf16 %v2732_v17 }
 0x11c   : > { %1710 = vst [vmem:[%s2393_s15 + $0x68] sm:$0xf] %v1032_v15  ;;  %v602_v58 = vmax.f32 %v575_v29, 0.0  ;;  %v707_v36 = vadd.f32 %v706_v41, %v693_v57  ;;  %v1006_v52 = vunpack.c.l.bf16 %v2739_v53  ;;  %v1110_v34 = vunpack.c.l.bf16 %v2748_v56  ;;  %v1910_v57 = vld [vmem:[%s2999_s2] ss:$0 sm:$0xff] }
 0x11d   : > { %1738 = vst [vmem:[%s2393_s15 + $0x58] sm:$0xf] %v1136_v30  ;;  %v577_v19 = vadd.f32 %v576_v14, %v528_v32  ;;  %v1238_v23 = vunpack.c.h.bf16 %v2732_v17  ;;  %v1340_v38 = vunpack.c.h.bf16 %v2742_v8  ;;  %v695_v13 = vadd.f32 %v2207_v12, %v694_v27  ;;  %v2796_v27 = vld [vmem:[%s2219_s11 + $0xa0] sm:$0xff]  }
 0x11e   : > { %1769 = vst [vmem:[%s2393_s15 + $0x64] sm:$0xf] %v1264_v0  ;;  %v722_v41 = vrot.slane %v602_v58, 7  ;;  %v773_v51 = vrot.slane %v602_v58, 1  ;;  %v842_v43 = vmul.f32 0.75, %v602_v58  ;;  %v2764_v31 = vmax.f32 %v707_v36, 0.0  ;;  %v532_v36 = vpop.f32.mrf.mxu0 }
 0x11f   : > { %1770 = vst [vmem:[%s2393_s15 + $0x6c] sm:$0xf] %v1265_v62  ;;  %v603_v50 = vmax.f32 %v577_v19, 0.0  ;;  %v709_v9 = vadd.f32 %v708_v20, %v695_v13  ;;  %v531_v14 = vadd.f32 %v1910_v57, %v530_v45  ;;  %v533_v10 = vadd.f32 %v1910_v57, %v532_v36 }
 0x120   : > { %1797 = vst [vmem:[%s2393_s15 + $0x54] sm:$0xf] %v1366_v48  ;;  %v2777_v40 = vmul.f32 0.75, %v2764_v31  ;;  %v579_v48 = vpop.f32.mrf.mxu1  ;;  %v3026_v36 = vunpack.c.h.bf16 %v2739_v53 }
 0x121   : > { %1798 = vst [vmem:[%s2393_s15 + $0x5c] sm:$0xf] %v1367_v37  ;;  %v730_v25 = vrot.slane %v603_v50, 7  ;;  %v781_v3 = vrot.slane %v603_v50, 1  ;;  %v843_v47 = vmul.f32 0.75, %v603_v50  ;;  %v580_v15 = vadd.f32 %v579_v48, %v531_v14 }
 0x123   : > { %v739_v0 = vsel %vm734_vm1, %v722_v41, %v730_v25  ;;  %v747_v37 = vsel %vm734_vm1, %v730_v25, %v722_v41  ;;  %v790_v62 = vsel %vm785_vm2, %v773_v51, %v781_v3  ;;  %v798_v32 = vsel %vm785_vm2, %v781_v3, %v773_v51 }
 0x124   : > { %v759_v19 = vsel %vm716_vm0, %v602_v58, %v747_v37  ;;  %v811_v45 = vsel %vm768_vm3, %v603_v50, %v798_v32  ;;  %v827_v20 = vmul.f32 0.25, %v739_v0  ;;  %v874_v13 = vmul.f32 0.25, %v790_v62 }
 0x125   : > { %v826_v29 = vmul.f32 0.25, %v759_v19  ;;  %v875_v41 = vmul.f32 0.25, %v811_v45  ;;  %v712_v25 = vmax.f32 %v709_v9, 0.0  ;;  %v1007_v51 = vunpack.c.l.bf16 %v2796_v27 }
 0x126   : > { %v859_v12 = vadd.f32 %v843_v47, %v827_v20  ;;  %v890_v33 = vadd.f32 %v874_v13, %v842_v43  ;;  %v3025_v32 = vunpack.c.l.bf16 %v2742_v8  ;;  %v3028_v8 = vrot.slane %v2764_v31, 7 }
 0x127   : > { %v858_v3 = vadd.f32 %v842_v43, %v826_v29  ;;  %v891_v30 = vadd.f32 %v875_v41, %v843_v47  ;;  %v921_v35 = vrot.slane %v712_v25, 7  ;;  %v927_v42 = vrot.slane %v712_v25, 1 }
 0x128   : > { %v2803_v58 = vmul.f32 0.25, %v859_v12  ;;  %v2805_v37 = vmul.f32 0.75, %v859_v12  ;;  %v2807_v50 = vmul.f32 0.25, %v890_v33  ;;  %v2809_v0 = vmul.f32 0.75, %v890_v33 }
 0x129   : > { %v2811_v62 = vmul.f32 0.25, %v858_v3  ;;  %v2813_v9 = vmul.f32 0.75, %v858_v3  ;;  %v2815_v48 = vmul.f32 0.25, %v891_v30  ;;  %v2817_v57 = vmul.f32 0.75, %v891_v30 }
 0x12a   : > { %v977_v43 = vadd.f32 %v2805_v37, %v2685_v60  ;;  %v1081_v47 = vadd.f32 %v2689_v59, %v2803_v58  ;;  %v1210_v12 = vadd.f32 %v2809_v0, %v2696_v7  ;;  %v1312_v33 = vadd.f32 %v2705_v4, %v2807_v50 }
 0x12b   : > { %v976_v29 = vadd.f32 %v2813_v9, %v2683_v54  ;;  %v1080_v14 = vadd.f32 %v2687_v44, %v2811_v62  ;;  %v1211_v30 = vadd.f32 %v2817_v57, %v2698_v49  ;;  %v1313_v60 = vadd.f32 %v2707_v61, %v2815_v48 }
 0x12c   : > { %v1020_v59 = vadd.f32 %v1006_v52, %v977_v43  ;;  %v1124_v7 = vadd.f32 %v1110_v34, %v1081_v47  ;;  %v1252_v4 = vadd.f32 %v1238_v23, %v1210_v12  ;;  %v1354_v54 = vadd.f32 %v1340_v38, %v1312_v33  ;;  %v2867_v33 = vld [vmem:[%s2219_s11 + $0xa8] sm:$0xff]  }
 0x12d   : > { %v1019_v44 = vadd.f32 %v1005_v46, %v976_v29  ;;  %v1123_v49 = vadd.f32 %v3025_v32, %v1080_v14  ;;  %v1253_v61 = vadd.f32 %v3026_v36, %v1211_v30  ;;  %v3027_v52 = vunpack.c.h.bf16 %v2748_v56  ;;  %v2870_v29 = vld [vmem:[%s2219_s11 + $0xc0] sm:$0xff]  }
 0x12e   : > { %v1034_v34 = vpack.c.bf16 %v1020_v59, %v1020_v59  ;;  %v1138_v45 = vpack.c.bf16 %v1124_v7, %v1124_v7  ;;  %v1266_v20 = vpack.c.bf16 %v1252_v4, %v1252_v4  ;;  %v1368_v23 = vpack.c.bf16 %v1354_v54, %v1354_v54  ;;  %v581_v54 = vpop.f32.mrf.mxu1 }
 0x12f   : > { %v1355_v19 = vadd.f32 %v3027_v52, %v1313_v60  ;;  %v1033_v38 = vpack.c.bf16 %v1019_v44, %v1019_v44  ;;  %v1137_v17 = vpack.c.bf16 %v1123_v49, %v1123_v49  ;;  %v1267_v46 = vpack.c.bf16 %v1253_v61, %v1253_v61  ;;  %v2881_v49 = vld [vmem:[%s2219_s11 + $0xc8] sm:$0xff]  }
 0x130   : > { %1712 = vst [vmem:[%s2393_s15 + $0x88] sm:$0xf] %v1034_v34  ;;  %v922_v53 = vsel %vm734_vm1, %v3028_v8, %v921_v35  ;;  %v3029_v56 = vmov %v3028_v8  ;;  %v3030_v3 = vrot.slane %v2764_v31, 1  ;;  %v935_v60 = vmul.f32 0.75, %v712_v25 }
 0x131   : > { %v1369_v13 = vpack.c.bf16 %v1355_v19, %v1355_v19  ;;  %v923_v41 = vsel %vm734_vm1, %v921_v35, %v3029_v56  ;;  %1711 = vst [vmem:[%s2393_s15 + $0x80] sm:$0xf] %v1033_v38  ;;  %v933_v30 = vmul.f32 0.25, %v922_v53  ;;  %v604_v4 = vmax.f32 %v580_v15, 0.0  ;;  %v2889_v15 = vld [vmem:[%s2219_s11 + $0x90] sm:$0xff]  }
 0x132   : > { %v928_v43 = vsel %vm785_vm2, %v3030_v3, %v927_v42  ;;  %v3031_v47 = vmov %v3030_v3  ;;  %v924_v35 = vsel %vm716_vm0, %v2764_v31, %v923_v41  ;;  %1739 = vst [vmem:[%s2393_s15 + $0x70] sm:$0xf] %v1137_v17  ;;  %v582_v32 = vadd.f32 %v581_v54, %v533_v10 }
 0x133   : > { %v929_v12 = vsel %vm785_vm2, %v927_v42, %v3031_v47  ;;  %v932_v59 = vmul.f32 0.25, %v924_v35  ;;  %v938_v42 = vmul.f32 0.25, %v928_v43  ;;  %1740 = vst [vmem:[%s2393_s15 + $0x78] sm:$0xf] %v1138_v45  ;;  %v937_v44 = vadd.f32 %v935_v60, %v933_v30 }
 0x134   : > { %v931_v14 = vsel %vm768_vm3, %v712_v25, %v929_v12  ;;  %v1008_v31 = vunpack.c.l.bf16 %v2867_v33  ;;  %v1009_v36 = vunpack.c.l.bf16 %v2870_v29  ;;  %1771 = vst [vmem:[%s2393_s15 + $0x84] sm:$0xf] %v1266_v20  ;;  %v723_v19 = vrot.slane %v604_v4, 7 }
 0x135   : > { %v939_v7 = vmul.f32 0.25, %v931_v14  ;;  %v936_v25 = vadd.f32 %v2777_v40, %v932_v59  ;;  %v940_v61 = vadd.f32 %v938_v42, %v2777_v40  ;;  %1772 = vst [vmem:[%s2393_s15 + $0x8c] sm:$0xf] %v1267_v46  ;;  %v1161_v34 = vmul.f32 0.25, %v937_v44 }
 0x136   : > { %v774_v45 = vrot.slane %v604_v4, 1  ;;  %v844_v10 = vmul.f32 0.75, %v604_v4  ;;  %v605_v38 = vmax.f32 %v582_v32, 0.0  ;;  %1799 = vst [vmem:[%s2393_s15 + $0x74] sm:$0xf] %v1368_v23  ;;  %v1010_v20 = vunpack.c.l.bf16 %v2881_v49 }
 0x137   : > { %v941_v52 = vadd.f32 %v939_v7, %v935_v60  ;;  %v1160_v17 = vmul.f32 0.25, %v936_v25  ;;  %v1390_v8 = vmul.f32 0.25, %v940_v61  ;;  %1800 = vst [vmem:[%s2393_s15 + $0x7c] sm:$0xf] %v1369_v13  ;;  %v1163_v56 = vadd.f32 %v1161_v34, %v2477_v11  ;;  %v2919_v25 = vld [vmem:[%s2219_s11 + $0x98] sm:$0xff]   ;;  %v2922_v61 = vld [vmem:[%s2219_s11 + $0xb0] sm:$0xff]  }
 0x138   : > { %v731_v41 = vrot.slane %v605_v38, 7  ;;  %v782_v40 = vrot.slane %v605_v38, 1  ;;  %v845_v3 = vmul.f32 0.75, %v605_v38  ;;  %v1111_v23 = vunpack.c.l.bf16 %v2889_v15 }
 0x139   : > { %v1391_v53 = vmul.f32 0.25, %v941_v52  ;;  %v1162_v43 = vadd.f32 %v1160_v17, %v2479_v39  ;;  %v1392_v46 = vadd.f32 %v1390_v8, %v2481_v28  ;;  %v3032_v12 = vunpack.c.l.bf16 %v2771_v16 }
 0x13a   : > { %v740_v11 = vsel %vm734_vm1, %v723_v19, %v731_v41  ;;  %v748_v13 = vsel %vm734_vm1, %v731_v41, %v723_v19  ;;  %v791_v39 = vsel %vm785_vm2, %v774_v45, %v782_v40  ;;  %v3033_v28 = vunpack.c.l.bf16 %v2761_v63 }
 0x13b   : > { %v1393_v47 = vadd.f32 %v1391_v53, %v2486_v55  ;;  %v1170_v35 = vadd.f32 %v3032_v12, %v1163_v56  ;;  %v3034_v55 = vunpack.c.h.bf16 %v2761_v63  ;;  %v3035_v60 = vunpack.c.h.bf16 %v2771_v16  ;;  %v2925_v63 = vld [vmem:[%s2219_s11 + $0xb8] sm:$0xff]  }
 0x13c   : > { %v1169_v14 = vadd.f32 %v3033_v28, %v1162_v43  ;;  %v761_v42 = vsel %vm716_vm0, %v604_v4, %v748_v13  ;;  %v799_v54 = vsel %vm785_vm2, %v782_v40, %v774_v45  ;;  %v829_v32 = vmul.f32 0.25, %v740_v11 }
 0x13d   : > { %v1398_v30 = vadd.f32 %v3034_v55, %v1392_v46  ;;  %v1399_v59 = vadd.f32 %v3035_v60, %v1393_v47  ;;  %v1172_v7 = vpack.c.bf16 %v1170_v35, %v1170_v35  ;;  %v828_v44 = vmul.f32 0.25, %v761_v42 }
 0x13e   : > { %v1171_v52 = vpack.c.bf16 %v1169_v14, %v1169_v14  ;;  %v813_v4 = vsel %vm768_vm3, %v605_v38, %v799_v54  ;;  %v861_v34 = vadd.f32 %v845_v3, %v829_v32  ;;  %v876_v45 = vmul.f32 0.25, %v791_v39 }
 0x13f   : > { %v1400_v16 = vpack.c.bf16 %v1398_v30, %v1398_v30  ;;  %v1401_v19 = vpack.c.bf16 %v1399_v59, %v1399_v59  ;;  %1750 = vst [vmem:[%s2393_s15 + $0xf8] sm:$0xf] %v1172_v7  ;;  %v860_v18 = vadd.f32 %v844_v10, %v828_v44  ;;  %v877_v17 = vmul.f32 0.25, %v813_v4 }
 0x140   : > { %1749 = vst [vmem:[%s2393_s15 + $0xf0] sm:$0xf] %v1171_v52  ;;  %v1112_v8 = vunpack.c.l.bf16 %v2919_v25  ;;  %v1113_v53 = vunpack.c.l.bf16 %v2922_v61  ;;  %v1114_v56 = vunpack.c.l.bf16 %v2925_v63  ;;  %v1240_v41 = vunpack.c.h.bf16 %v2796_v27 }
 0x141   : > { %1809 = vst [vmem:[%s2393_s15 + $0xf4] sm:$0xf] %v1400_v16  ;;  %v892_v40 = vadd.f32 %v876_v45, %v844_v10  ;;  %v893_v43 = vadd.f32 %v877_v17, %v845_v3  ;;  %v952_v26 = vmul.f32 0.25, %v860_v18  ;;  %v953_v38 = vmul.f32 0.25, %v861_v34 }
 0x142   : > { %1810 = vst [vmem:[%s2393_s15 + $0xfc] sm:$0xf] %v1401_v19  ;;  %v964_v46 = vmul.f32 0.75, %v860_v18  ;;  %v965_v47 = vmul.f32 0.75, %v861_v34  ;;  %v1241_v12 = vunpack.c.h.bf16 %v2867_v33  ;;  %v1242_v35 = vunpack.c.h.bf16 %v2870_v29  ;;  %v3036_v18 = vld [vmem:[#allocation2_spill] sm:$0xff] }
 0x143   : > { %v980_v11 = vadd.f32 %v2321_v22, %v952_v26  ;;  %v981_v13 = vadd.f32 %v2313_v2, %v953_v38  ;;  %v1082_v39 = vadd.f32 %v2813_v9, %v952_v26  ;;  %v1083_v28 = vadd.f32 %v2805_v37, %v953_v38 }
 0x144   : > { %v978_v10 = vadd.f32 %v964_v46, %v2811_v62  ;;  %v979_v3 = vadd.f32 %v965_v47, %v2803_v58  ;;  %v1084_v14 = vadd.f32 %v964_v46, %v2319_v21  ;;  %v1085_v55 = vadd.f32 %v965_v47, %v2311_v1 }
 0x145   : > { %v1023_v30 = vadd.f32 %v1009_v36, %v980_v11  ;;  %v1024_v60 = vadd.f32 %v1010_v20, %v981_v13  ;;  %v1125_v22 = vadd.f32 %v1111_v23, %v1082_v39  ;;  %v1126_v59 = vadd.f32 %v1112_v8, %v1083_v28 }
 0x146   : > { %v1021_v2 = vadd.f32 %v1007_v51, %v978_v10  ;;  %v1022_v37 = vadd.f32 %v1008_v31, %v979_v3  ;;  %v1127_v62 = vadd.f32 %v1113_v53, %v1084_v14  ;;  %v1128_v58 = vadd.f32 %v1114_v56, %v1085_v55 }
 0x147   : > { %v1037_v9 = vpack.c.bf16 %v1023_v30, %v1023_v30  ;;  %v1038_v21 = vpack.c.bf16 %v1024_v60, %v1024_v60  ;;  %v1139_v42 = vpack.c.bf16 %v1125_v22, %v1125_v22  ;;  %v1140_v1 = vpack.c.bf16 %v1126_v59, %v1126_v59 }
 0x148   : > { %v1035_v29 = vpack.c.bf16 %v1021_v2, %v1021_v2  ;;  %v1036_v36 = vpack.c.bf16 %v1022_v37, %v1022_v37  ;;  %v1141_v7 = vpack.c.bf16 %v1127_v62, %v1127_v62  ;;  %v1142_v20 = vpack.c.bf16 %v1128_v58, %v1128_v58 }
 0x149   : > { %1715 = vst [vmem:[%s2393_s15 + $0xc0] sm:$0xf] %v1037_v9  ;;  %v1186_v23 = vmul.f32 0.25, %v892_v40  ;;  %v1187_v27 = vmul.f32 0.25, %v893_v43  ;;  %v1198_v51 = vmul.f32 0.75, %v892_v40  ;;  %v1199_v54 = vmul.f32 0.75, %v893_v43 }
 0x14a   : > { %1713 = vst [vmem:[%s2393_s15 + $0xa0] sm:$0xf] %v1035_v29  ;;  %v1243_v33 = vunpack.c.h.bf16 %v2881_v49  ;;  %v1342_v31 = vunpack.c.h.bf16 %v2889_v15  ;;  %v1343_v44 = vunpack.c.h.bf16 %v2919_v25  ;;  %v1344_v32 = vunpack.c.h.bf16 %v2922_v61 }
 0x14b   : > { %1714 = vst [vmem:[%s2393_s15 + $0xa8] sm:$0xf] %v1036_v36  ;;  %v1212_v52 = vadd.f32 %v1198_v51, %v2807_v50  ;;  %v1213_v16 = vadd.f32 %v1199_v54, %v2815_v48  ;;  %v1214_v19 = vadd.f32 %v2317_v6, %v1186_v23  ;;  %v1215_v4 = vadd.f32 %v2325_v24, %v1187_v27 }
 0x14c   : > { %1716 = vst [vmem:[%s2393_s15 + $0xc8] sm:$0xf] %v1038_v21  ;;  %v1314_v49 = vadd.f32 %v2809_v0, %v1186_v23  ;;  %v1315_v15 = vadd.f32 %v2817_v57, %v1187_v27  ;;  %v1316_v25 = vadd.f32 %v1198_v51, %v2315_v5  ;;  %v1317_v61 = vadd.f32 %v1199_v54, %v3036_v18 }
 0x14d   : > { %1741 = vst [vmem:[%s2393_s15 + $0x90] sm:$0xf] %v1139_v42  ;;  %v1254_v34 = vadd.f32 %v1240_v41, %v1212_v52  ;;  %v1255_v50 = vadd.f32 %v1241_v12, %v1213_v16  ;;  %v1256_v48 = vadd.f32 %v1242_v35, %v1214_v19  ;;  %v1257_v6 = vadd.f32 %v1243_v33, %v1215_v4 }
 0x14e   : > { %1742 = vst [vmem:[%s2393_s15 + $0x98] sm:$0xf] %v1140_v1  ;;  %v1345_v24 = vunpack.c.h.bf16 %v2925_v63  ;;  %v1356_v45 = vadd.f32 %v1342_v31, %v1314_v49  ;;  %v1357_v0 = vadd.f32 %v1343_v44, %v1315_v15  ;;  %v1358_v8 = vadd.f32 %v1344_v32, %v1316_v25 }
 0x14f   : > { %1743 = vst [vmem:[%s2393_s15 + $0xb0] sm:$0xf] %v1141_v7  ;;  %v1268_v5 = vpack.c.bf16 %v1254_v34, %v1254_v34  ;;  %v1269_v57 = vpack.c.bf16 %v1255_v50, %v1255_v50  ;;  %v1270_v17 = vpack.c.bf16 %v1256_v48, %v1256_v48  ;;  %v1271_v53 = vpack.c.bf16 %v1257_v6, %v1257_v6 }
 0x150   : > { %1744 = vst [vmem:[%s2393_s15 + $0xb8] sm:$0xf] %v1142_v20  ;;  %v1359_v56 = vadd.f32 %v1345_v24, %v1317_v61  ;;  %v1370_v41 = vpack.c.bf16 %v1356_v45, %v1356_v45  ;;  %v1371_v40 = vpack.c.bf16 %v1357_v0, %v1357_v0  ;;  %v1372_v63 = vpack.c.bf16 %v1358_v8, %v1358_v8 }
 0x151   : > { %1773 = vst [vmem:[%s2393_s15 + $0xa4] sm:$0xf] %v1268_v5 }
 0x152   : > { %1774 = vst [vmem:[%s2393_s15 + $0xac] sm:$0xf] %v1269_v57  ;;  %v1373_v43 = vpack.c.bf16 %v1359_v56, %v1359_v56 }
 0x153   : > { %1775 = vst [vmem:[%s2393_s15 + $0xc4] sm:$0xf] %v1270_v17 }
 0x154   : > { %1776 = vst [vmem:[%s2393_s15 + $0xcc] sm:$0xf] %v1271_v53 }
 0x155   : > { %1801 = vst [vmem:[%s2393_s15 + $0x94] sm:$0xf] %v1370_v41 }
 0x156   : > { %1802 = vst [vmem:[%s2393_s15 + $0x9c] sm:$0xf] %v1371_v40 }
 0x157   : > { %1803 = vst [vmem:[%s2393_s15 + $0xb4] sm:$0xf] %v1372_v63 }
 0x158   : > { %1804 = vst [vmem:[%s2393_s15 + $0xbc] sm:$0xf] %v1373_v43 }
 0x159 PF: > { %s14_s19 = sadd.s32 1, %s1949_s19   ;;  %s3037_s15 = smov %s1941_s17 }
 0x15a   : > { %p11_p9 = scmp.ge.s32.totalorder %s14_s19, 6   ;;  %s3038_s16 = smov %s1945_s18 }
 0x15b   : > { %s3039_s17 = smov %s3042_s20  ;;  %s3040_s18 = smov %s3046_s21 }
 0x15c   :  { %13 = sbr.rel (!%p11_p9) target bundleno = 3 (0x3), region = 78 }

</bundles_post_ra>
